<compile_context>
chip_gen: v7x
topology: tpu7x:2x2x1
jax: 0.10.0
libtpu: 0.0.40
codegen_flags: <defaults>
</compile_context>

<pallas_src>
import functools

import jax
import jax.numpy as jnp
from jax.experimental import pallas as pl
from jax.experimental.pallas import tpu as pltpu


# ----------------------------------------------------------------------------
# Small helpers
# ----------------------------------------------------------------------------
def _round_up(n: int, m: int) -> int:
    return (n + m - 1) // m * m


def _mxu_pad_granularity() -> int:
    """256 on v6e/v7x (256x256 MXU), 128 otherwise."""
    try:
        kind = jax.devices()[0].device_kind.lower()
    except Exception:
        return 128
    return 256 if ("v6" in kind or "v7" in kind) else 128


def _pad_dim(n: int, gran: int) -> int:
    p = _round_up(n, 128)
    if gran > 128 and p % gran != 0:
        p = _round_up(p, gran)
    return p


def _device_vmem_bytes() -> int:
    try:
        return int(pltpu.get_tpu_info().vmem_capacity_bytes)
    except Exception:
        return 64 << 20  # conservative: v7x per-TensorCore VMEM


def _drop_threshold(p):
    """Signed-int32 threshold: keep element iff int32_bits >= threshold.

    Raw PRNG bits are uniform over all 32-bit patterns, i.e. uniform over
    [-2^31, 2^31) when viewed as int32, so P(keep) = 1 - p exactly (up to
    1/2^32 quantization).  Returns None when dropout is disabled.
    """
    p = float(p)
    if p <= 0.0:
        return None
    t = int(round(p * (2.0 ** 32))) - 2 ** 31
    return max(-(2 ** 31), min(t, 2 ** 31 - 1))


def _estimate_vmem_bytes(tb, d_in_p, h1_p, h2_p, d_out_p, ext_bits):
    """Rough upper bound of the kernel's VMEM footprint for one batch tile."""
    blocks = 2 * tb * d_in_p * 2 + 2 * tb * d_out_p * 4      # x (bf16) + out (f32), 2 buffers
    if ext_bits:
        blocks += 2 * tb * (h1_p + h2_p) * 4                 # streamed int32 bits (test path)
    weights = 2 * ((d_in_p * h1_p + h1_p * h2_p + h2_p * d_out_p) * 2
                   + (h1_p + h2_p + d_out_p) * 4)            # assume double-buffered (worst case)
    interm = tb * (h1_p + h2_p) * (4 + 2)                    # f32 activations + bf16 copies
    return blocks + weights + interm


# ----------------------------------------------------------------------------
# Kernels
# ----------------------------------------------------------------------------
def _as_i32_bits(b):
    return b if b.dtype == jnp.int32 else pltpu.bitcast(b, jnp.int32)


def _mlp_forward(x_ref, w1_ref, b1_ref, w2_ref, b2_ref, w3_ref, b3_ref, o_ref,
                 draw1, draw2, t1, t2):
    """Shared fused body. x/weights are bf16 MXU inputs; math is f32.

    The 1/(1-p) inverted-dropout scales are pre-folded into w2/w3, so dropout
    here is a single int32 compare + select per element.
    """
    h1 = jnp.dot(x_ref[...], w1_ref[...], preferred_element_type=jnp.float32)
    h1 = jnp.maximum(h1 + b1_ref[...], 0.0)
    if t1 is not None:
        h1 = jnp.where(draw1(h1.shape) >= jnp.int32(t1), h1, 0.0)

    h2 = jnp.dot(h1.astype(jnp.bfloat16), w2_ref[...],
                 preferred_element_type=jnp.float32)
    h2 = jnp.maximum(h2 + b2_ref[...], 0.0)
    if t2 is not None:
        h2 = jnp.where(draw2(h2.shape) >= jnp.int32(t2), h2, 0.0)

    out = jnp.dot(h2.astype(jnp.bfloat16), w3_ref[...],
                  preferred_element_type=jnp.float32)
    o_ref[...] = (out + b3_ref[...]).astype(o_ref.dtype)


def dropout_mlp_kernel_prng(seed_ref, x_ref, w1_ref, b1_ref, w2_ref, b2_ref,
                            w3_ref, b3_ref, o_ref, *, t1, t2):
    """Default path: dropout masks from the on-chip PRNG (no streamed randoms)."""
    if (t1 is not None) or (t2 is not None):
        pltpu.prng_seed(seed_ref[0] + pl.program_id(0))   # distinct stream per tile

    def draw(shape):
        return _as_i32_bits(pltpu.prng_random_bits(shape))

    _mlp_forward(x_ref, w1_ref, b1_ref, w2_ref, b2_ref, w3_ref, b3_ref, o_ref,
                 draw, draw, t1, t2)


def dropout_mlp_kernel_extbits(x_ref, bits1_ref, bits2_ref, w1_ref, b1_ref,
                               w2_ref, b2_ref, w3_ref, b3_ref, o_ref, *, t1, t2):
    """Test / bit-reproducibility path: random bits streamed from the wrapper."""
    _mlp_forward(x_ref, w1_ref, b1_ref, w2_ref, b2_ref, w3_ref, b3_ref, o_ref,
                 lambda s: bits1_ref[...], lambda s: bits2_ref[...], t1, t2)


# ----------------------------------------------------------------------------
# Parameter preparation (one-time) and wrapper
# ----------------------------------------------------------------------------
def prepare_params(params, *, dropout1, dropout2, feature_pad=None):
    """ONE-TIME transform: fold 1/(1-p) into the next layer's weights, pad all
    feature dims to an MXU-friendly multiple, and cast weights to bf16
    (biases stay f32)."""
    w1, b1, w2, b2, w3, b3 = [jnp.asarray(a, jnp.float32) for a in params]
    d_in, h1 = w1.shape
    h1b, h2 = w2.shape
    h2b, d_out = w3.shape
    assert h1b == h1 and h2b == h2
    if feature_pad is None:
        feature_pad = _mxu_pad_granularity()

    s1 = 0.0 if dropout1 >= 1.0 else 1.0 / (1.0 - float(dropout1))
    s2 = 0.0 if dropout2 >= 1.0 else 1.0 / (1.0 - float(dropout2))
    w2 = w2 * jnp.float32(s1)
    w3 = w3 * jnp.float32(s2)

    d_in_p = _pad_dim(d_in, feature_pad)
    h1_p = _pad_dim(h1, feature_pad)
    h2_p = _pad_dim(h2, feature_pad)
    d_out_p = _pad_dim(d_out, feature_pad)

    def pad2(a, rows, cols, dtype):
        a = a.reshape(a.shape[0], a.shape[-1]) if a.ndim == 2 else a.reshape(1, -1)
        a = jnp.pad(a, ((0, rows - a.shape[0]), (0, cols - a.shape[1])))
        return a.astype(dtype)

    prepared = (pad2(w1, d_in_p, h1_p, jnp.bfloat16), pad2(b1, 1, h1_p, jnp.float32),
                pad2(w2, h1_p, h2_p, jnp.bfloat16), pad2(b2, 1, h2_p, jnp.float32),
                pad2(w3, h2_p, d_out_p, jnp.bfloat16), pad2(b3, 1, d_out_p, jnp.float32))
    meta = dict(d_in=d_in, h1=h1, h2=h2, d_out=d_out,
                d_in_p=d_in_p, h1_p=h1_p, h2_p=h2_p, d_out_p=d_out_p)
    return prepared, meta


def dropout_mlp(x, prepared, meta, *, dropout1, dropout2, rng_key,
                batch_tile=512, use_external_rng=False):
    """Fused forward.  x: (B, ...) flattened to (B, D) like torch's reshape.

    Returns (out, aux); aux = (bits1, bits2) int32 streams when the external
    RNG path is used (so a reference can reproduce the exact mask), else None.
    """
    w1, b1, w2, b2, w3, b3 = prepared
    B = int(x.shape[0])
    x2d = x.reshape(B, -1)
    assert x2d.shape[1] == meta["d_in"], "input feature size mismatch"
    d_in, d_in_p = meta["d_in"], meta["d_in_p"]
    h1_p, h2_p, d_out_p = meta["h1_p"], meta["h2_p"], meta["d_out_p"]

    t1 = _drop_threshold(dropout1)
    t2 = _drop_threshold(dropout2)

    # ---- batch tiling: VMEM-budget aware; >=2 tiles for medium batches so the
    # "parallel" grid axis can shard over v7x's two TensorCores; tiles evened
    # out so the final tile wastes at most a few rows.
    vmem_cap = _device_vmem_bytes()
    budget = int(0.75 * vmem_cap)
    b8 = _round_up(max(B, 1), 8)
    if b8 <= 16:
        tb = b8
    else:
        tb = min(max(8, _round_up(batch_tile, 8)), _round_up((b8 + 1) // 2, 8))
    while tb > 8 and _estimate_vmem_bytes(tb, d_in_p, h1_p, h2_p, d_out_p,
                                          use_external_rng) > budget:
        tb = max(8, _round_up(tb // 2, 8))
    n_tiles = -(-b8 // tb)
    tb = _round_up(-(-b8 // n_tiles), 8)
    b_pad = n_tiles * tb

    est = _estimate_vmem_bytes(tb, d_in_p, h1_p, h2_p, d_out_p, use_external_rng)
    vmem_limit = int(min(0.85 * vmem_cap, max(32 << 20, 1.3 * est)))

    # ---- input: flatten, cast to bf16 (halves x DMA); pad only when needed.
    x_in = x2d.astype(jnp.bfloat16)
    if x_in.shape != (b_pad, d_in_p):
        x_in = jnp.pad(x_in, ((0, b_pad - B), (0, d_in_p - d_in)))

    out_shape = jax.ShapeDtypeStruct((b_pad, d_out_p), jnp.float32)
    grid = (n_tiles,)

    def batch_spec(cols):
        return pl.BlockSpec((tb, cols), lambda i: (i, 0))

    def _run(kind, weight_buffers):
        if weight_buffers is None:
            def resident(shape):
                return pl.BlockSpec(shape, lambda i: (0,) * len(shape))
        else:
            def resident(shape):  # constant block index -> stays resident in VMEM
                return pl.BlockSpec(shape, lambda i: (0,) * len(shape),
                                    pipeline_mode=pl.Buffered(weight_buffers))

        weight_specs = [resident(w1.shape), resident(b1.shape),
                        resident(w2.shape), resident(b2.shape),
                        resident(w3.shape), resident(b3.shape)]
        cparams = pltpu.CompilerParams(dimension_semantics=("parallel",),
                                       vmem_limit_bytes=vmem_limit)

        if kind == "prng":
            seed = jax.random.randint(rng_key, (1,), minval=-(2 ** 31),
                                      maxval=2 ** 31 - 1, dtype=jnp.int32)
            kern = functools.partial(dropout_mlp_kernel_prng, t1=t1, t2=t2)
            in_specs = ([pl.BlockSpec(memory_space=pltpu.MemorySpace.SMEM),
                         batch_spec(d_in_p)] + weight_specs)
            args = (seed, x_in, w1, b1, w2, b2, w3, b3)
            aux = None
        else:  # "ext": streamed int32 random bits (test / reproducibility path)
            kb1, kb2 = jax.random.split(rng_key)
            bits1 = jax.lax.bitcast_convert_type(
                jax.random.bits(kb1, (b_pad, h1_p), jnp.uint32), jnp.int32)
            bits2 = jax.lax.bitcast_convert_type(
                jax.random.bits(kb2, (b_pad, h2_p), jnp.uint32), jnp.int32)
            kern = functools.partial(dropout_mlp_kernel_extbits, t1=t1, t2=t2)
            in_specs = ([batch_spec(d_in_p), batch_spec(h1_p), batch_spec(h2_p)]
                        + weight_specs)
            args = (x_in, bits1, bits2, w1, b1, w2, b2, w3, b3)
            aux = (bits1, bits2)

        out = pl.pallas_call(
            kern,
            out_shape=out_shape,
            grid=grid,
            in_specs=in_specs,
            out_specs=batch_spec(d_out_p),
            compiler_params=cparams,
        )(*args)
        return out, aux

    # Preferred: on-chip PRNG + single-buffered resident weights; fall back to
    # default buffering and, only if needed, to the streamed-bits path.
    attempts = []
    for kind in (("ext",) if use_external_rng else ("prng", "ext")):
        for wb in (1, None):
            attempts.append((kind, wb))
    last_err = None
    out = aux = None
    for kind, wb in attempts:
        try:
            out, aux = _run(kind, wb)
            break
        except Exception as e:  # fall back to the next configuration
            last_err = e
    else:
        raise last_err

    return out[:B, : meta["d_out"]], aux


# ----------------------------------------------------------------------------
# Init + pure-JAX reference (for validation)
# ----------------------------------------------------------------------------
def init_params(key, input_size, num_hiddens1, num_hiddens2, output_size):
    """Deterministic init mimicking nn.Linear default (U[-1/sqrt(fan_in), +])."""
    def linear(k, fan_in, fan_out):
        kw, kb = jax.random.split(k)
        bound = 1.0 / (fan_in ** 0.5)
        w = jax.random.uniform(kw, (fan_in, fan_out), jnp.float32, -bound, bound)
        b = jax.random.uniform(kb, (1, fan_out), jnp.float32, -bound, bound)
        return w, b

    k1, k2, k3 = jax.random.split(key, 3)
    w1, b1 = linear(k1, input_size, num_hiddens1)
    w2, b2 = linear(k2, num_hiddens1, num_hiddens2)
    w3, b3 = linear(k3, num_hiddens2, output_size)
    return (w1, b1, w2, b2, w3, b3)


def _reference(x, params, dropout1, dropout2, bits1=None, bits2=None):
    """f32 reference of the torch module; if int32 bit streams are given, the
    keep mask uses the SAME rule as the kernel (bits >= threshold)."""
    w1, b1, w2, b2, w3, b3 = params
    B = x.shape[0]
    x2d = x.reshape(B, -1).astype(jnp.float32)
    t1 = _drop_threshold(dropout1)
    t2 = _drop_threshold(dropout2)

    h1 = jnp.maximum(x2d @ w1 + b1, 0.0)
    if t1 is not None and bits1 is not None:
        keep1 = bits1[:B, : w1.shape[1]] >= jnp.int32(t1)
        h1 = jnp.where(keep1, h1 / (1.0 - dropout1), 0.0)

    h2 = jnp.maximum(h1 @ w2 + b2, 0.0)
    if t2 is not None and bits2 is not None:
        keep2 = bits2[:B, : w2.shape[1]] >= jnp.int32(t2)
        h2 = jnp.where(keep2, h2 / (1.0 - dropout2), 0.0)

    return h2 @ w3 + b3


# ----------------------------------------------------------------------------
# Self-test
# ----------------------------------------------------------------------------
if __name__ == "__main__":
    input_size = 32          # = 2*4*4 after flatten
    num_hiddens1 = 64
    num_hiddens2 = 64
    output_size = 16
    dropout1, dropout2 = 0.5, 0.3
    batch = 8

    key = jax.random.PRNGKey(0)
    kx, kp, kd = jax.random.split(key, 3)
    x = jax.random.normal(kx, (batch, 2, 4, 4), dtype=jnp.float32)
    params = init_params(kp, input_size, num_hiddens1, num_hiddens2, output_size)

    # 1) Dropout disabled -> deterministic, must match the f32 reference
    #    (tolerance covers bf16 MXU-input rounding only).
    prep0, meta0 = prepare_params(params, dropout1=0.0, dropout2=0.0)
    out0, _ = dropout_mlp(x, prep0, meta0, dropout1=0.0, dropout2=0.0, rng_key=kd)
    out0 = jax.block_until_ready(out0)
    ref0 = _reference(x, params, 0.0, 0.0)
    assert out0.shape == (batch, output_size) and out0.dtype == jnp.float32
    assert bool(jnp.all(jnp.isfinite(out0)))
    assert bool(jnp.allclose(out0, ref0, rtol=3e-2, atol=3e-2)), "no-dropout mismatch"

    # 2) Dropout on, streamed-bits test path -> reference uses the exact same mask.
    prep, meta = prepare_params(params, dropout1=dropout1, dropout2=dropout2)
    out1, bits = dropout_mlp(x, prep, meta, dropout1=dropout1, dropout2=dropout2,
                             rng_key=kd, use_external_rng=True)
    out1 = jax.block_until_ready(out1)
    ref1 = _reference(x, params, dropout1, dropout2, bits[0], bits[1])
    assert bool(jnp.allclose(out1, ref1, rtol=3e-2, atol=3e-2)), "dropout mismatch"

    # 3) Default fast path: dropout via the on-chip PRNG (no streamed randoms).
    out2, _ = dropout_mlp(x, prep, meta, dropout1=dropout1, dropout2=dropout2,
                          rng_key=kd)
    out2 = jax.block_until_ready(out2)
    assert out2.shape == (batch, output_size)
    assert bool(jnp.all(jnp.isfinite(out2)))
    # Dropout must actually drop something: differ from the "all elements kept" result.
    all_keep1 = jnp.full((batch, num_hiddens1), 2 ** 31 - 1, jnp.int32)
    all_keep2 = jnp.full((batch, num_hiddens2), 2 ** 31 - 1, jnp.int32)
    ref_all_kept = _reference(x, params, dropout1, dropout2, all_keep1, all_keep2)
    assert float(jnp.max(jnp.abs(out2 - ref_all_kept))) > 1e-3, "dropout not applied"

    print("KERNEL_OK")
</pallas_src>

<mosaic_0001>
module attributes {stable_mosaic.version = 11 : i64} {
  func.func @dropout_mlp_kernel_prng(%arg0: i32, %arg1: memref<1xi32, #tpu.memory_space<smem>>, %arg2: memref<8x128xbf16, #tpu.memory_space<vmem>>, %arg3: memref<128x128xbf16, #tpu.memory_space<vmem>>, %arg4: memref<1x128xf32, #tpu.memory_space<vmem>>, %arg5: memref<128x128xbf16, #tpu.memory_space<vmem>>, %arg6: memref<1x128xf32, #tpu.memory_space<vmem>>, %arg7: memref<128x128xbf16, #tpu.memory_space<vmem>>, %arg8: memref<1x128xf32, #tpu.memory_space<vmem>>, %arg9: memref<8x128xf32, #tpu.memory_space<vmem>>) attributes {dimension_semantics = [#tpu.dimension_semantics<parallel>], iteration_bounds = array<i64: 1>, scalar_prefetch = 0 : i64, scratch_operands = 0 : i64, tpu.core_type = #tpu.core_type<tc>, window_params = [{transform_indices = @transform_0, window_bounds = array<i64: 1>}, {transform_indices = @transform_1, window_bounds = array<i64: 8, 128>}, {pipeline_mode = #tpu.pipeline_mode<synchronous>, transform_indices = @transform_2, window_bounds = array<i64: 128, 128>}, {pipeline_mode = #tpu.pipeline_mode<synchronous>, transform_indices = @transform_3, window_bounds = array<i64: 1, 128>}, {pipeline_mode = #tpu.pipeline_mode<synchronous>, transform_indices = @transform_4, window_bounds = array<i64: 128, 128>}, {pipeline_mode = #tpu.pipeline_mode<synchronous>, transform_indices = @transform_5, window_bounds = array<i64: 1, 128>}, {pipeline_mode = #tpu.pipeline_mode<synchronous>, transform_indices = @transform_6, window_bounds = array<i64: 128, 128>}, {pipeline_mode = #tpu.pipeline_mode<synchronous>, transform_indices = @transform_7, window_bounds = array<i64: 1, 128>}, {transform_indices = @transform_8, window_bounds = array<i64: 8, 128>}]} {
    %c0 = arith.constant 0 : index
    %c0_0 = arith.constant 0 : index
    %0 = vector.load %arg2[%c0, %c0_0] : memref<8x128xbf16, #tpu.memory_space<vmem>>, vector<8x128xbf16>
    %c0_1 = arith.constant 0 : index
    %c0_2 = arith.constant 0 : index
    %1 = vector.load %arg3[%c0_1, %c0_2] : memref<128x128xbf16, #tpu.memory_space<vmem>>, vector<128x128xbf16>
    %cst = arith.constant dense<0.000000e+00> : vector<8x128xf32>
    %2 = tpu.matmul %0, %1, %cst {dimension_numbers = #tpu.dot_dimension_numbers<[1], [0], [0], [1], [0, 0, 1, 1], [], []>} : vector<8x128xbf16>, vector<128x128xbf16>, vector<8x128xf32> -> vector<8x128xf32>
    %c0_3 = arith.constant 0 : index
    %c0_4 = arith.constant 0 : index
    %3 = vector.load %arg4[%c0_3, %c0_4] : memref<1x128xf32, #tpu.memory_space<vmem>>, vector<1x128xf32>
    %4 = vector.broadcast %3 : vector<1x128xf32> to vector<8x128xf32>
    %5 = arith.addf %2, %4 : vector<8x128xf32>
    %cst_5 = arith.constant 0.000000e+00 : f32
    %6 = vector.broadcast %cst_5 : f32 to vector<8x128xf32>
    %7 = arith.maximumf %5, %6 : vector<8x128xf32>
    %8 = arith.truncf %7 : vector<8x128xf32> to vector<8x128xbf16>
    %c0_6 = arith.constant 0 : index
    %c0_7 = arith.constant 0 : index
    %9 = vector.load %arg5[%c0_6, %c0_7] : memref<128x128xbf16, #tpu.memory_space<vmem>>, vector<128x128xbf16>
    %cst_8 = arith.constant dense<0.000000e+00> : vector<8x128xf32>
    %10 = tpu.matmul %8, %9, %cst_8 {dimension_numbers = #tpu.dot_dimension_numbers<[1], [0], [0], [1], [0, 0, 1, 1], [], []>} : vector<8x128xbf16>, vector<128x128xbf16>, vector<8x128xf32> -> vector<8x128xf32>
    %c0_9 = arith.constant 0 : index
    %c0_10 = arith.constant 0 : index
    %11 = vector.load %arg6[%c0_9, %c0_10] : memref<1x128xf32, #tpu.memory_space<vmem>>, vector<1x128xf32>
    %12 = vector.broadcast %11 : vector<1x128xf32> to vector<8x128xf32>
    %13 = arith.addf %10, %12 : vector<8x128xf32>
    %cst_11 = arith.constant 0.000000e+00 : f32
    %14 = vector.broadcast %cst_11 : f32 to vector<8x128xf32>
    %15 = arith.maximumf %13, %14 : vector<8x128xf32>
    %16 = arith.truncf %15 : vector<8x128xf32> to vector<8x128xbf16>
    %c0_12 = arith.constant 0 : index
    %c0_13 = arith.constant 0 : index
    %17 = vector.load %arg7[%c0_12, %c0_13] : memref<128x128xbf16, #tpu.memory_space<vmem>>, vector<128x128xbf16>
    %cst_14 = arith.constant dense<0.000000e+00> : vector<8x128xf32>
    %18 = tpu.matmul %16, %17, %cst_14 {dimension_numbers = #tpu.dot_dimension_numbers<[1], [0], [0], [1], [0, 0, 1, 1], [], []>} : vector<8x128xbf16>, vector<128x128xbf16>, vector<8x128xf32> -> vector<8x128xf32>
    %c0_15 = arith.constant 0 : index
    %c0_16 = arith.constant 0 : index
    %19 = vector.load %arg8[%c0_15, %c0_16] : memref<1x128xf32, #tpu.memory_space<vmem>>, vector<1x128xf32>
    %20 = vector.broadcast %19 : vector<1x128xf32> to vector<8x128xf32>
    %21 = arith.addf %18, %20 : vector<8x128xf32>
    %c0_17 = arith.constant 0 : index
    %c0_18 = arith.constant 0 : index
    %22 = vector.load %arg9[%c0_17, %c0_18] : memref<8x128xf32, #tpu.memory_space<vmem>>, vector<8x128xf32>
    tpu.vector_store %arg9[%c0_17, %c0_18], %21 {strides = array<i32>} : memref<8x128xf32, #tpu.memory_space<vmem>>, vector<8x128xf32>,
    return
  }
  func.func @transform_0(%arg0: i32) -> i32 {
    %c0_i32 = arith.constant 0 : i32
    %c0_i32_0 = arith.constant 0 : i32
    return %c0_i32 : i32
  }
  func.func @transform_1(%arg0: i32) -> (i32, i32) {
    %c0_i32 = arith.constant 0 : i32
    %c0_i32_0 = arith.constant 0 : i32
    return %arg0, %c0_i32 : i32, i32
  }
  func.func @transform_2(%arg0: i32) -> (i32, i32) {
    %c0_i32 = arith.constant 0 : i32
    %c0_i32_0 = arith.constant 0 : i32
    %c0_i32_1 = arith.constant 0 : i32
    return %c0_i32, %c0_i32_0 : i32, i32
  }
  func.func @transform_3(%arg0: i32) -> (i32, i32) {
    %c0_i32 = arith.constant 0 : i32
    %c0_i32_0 = arith.constant 0 : i32
    %c0_i32_1 = arith.constant 0 : i32
    return %c0_i32, %c0_i32_0 : i32, i32
  }
  func.func @transform_4(%arg0: i32) -> (i32, i32) {
    %c0_i32 = arith.constant 0 : i32
    %c0_i32_0 = arith.constant 0 : i32
    %c0_i32_1 = arith.constant 0 : i32
    return %c0_i32, %c0_i32_0 : i32, i32
  }
  func.func @transform_5(%arg0: i32) -> (i32, i32) {
    %c0_i32 = arith.constant 0 : i32
    %c0_i32_0 = arith.constant 0 : i32
    %c0_i32_1 = arith.constant 0 : i32
    return %c0_i32, %c0_i32_0 : i32, i32
  }
  func.func @transform_6(%arg0: i32) -> (i32, i32) {
    %c0_i32 = arith.constant 0 : i32
    %c0_i32_0 = arith.constant 0 : i32
    %c0_i32_1 = arith.constant 0 : i32
    return %c0_i32, %c0_i32_0 : i32, i32
  }
  func.func @transform_7(%arg0: i32) -> (i32, i32) {
    %c0_i32 = arith.constant 0 : i32
    %c0_i32_0 = arith.constant 0 : i32
    %c0_i32_1 = arith.constant 0 : i32
    return %c0_i32, %c0_i32_0 : i32, i32
  }
  func.func @transform_8(%arg0: i32) -> (i32, i32) {
    %c0_i32 = arith.constant 0 : i32
    %c0_i32_0 = arith.constant 0 : i32
    return %arg0, %c0_i32 : i32, i32
  }
}

module attributes {stable_mosaic.version = 11 : i64} {
  func.func @dropout_mlp_kernel_prng(%arg0: i32, %arg1: memref<1xi32, #tpu.memory_space<smem>>, %arg2: memref<8x128xbf16, #tpu.memory_space<vmem>>, %arg3: memref<128x128xbf16, #tpu.memory_space<vmem>>, %arg4: memref<1x128xf32, #tpu.memory_space<vmem>>, %arg5: memref<128x128xbf16, #tpu.memory_space<vmem>>, %arg6: memref<1x128xf32, #tpu.memory_space<vmem>>, %arg7: memref<128x128xbf16, #tpu.memory_space<vmem>>, %arg8: memref<1x128xf32, #tpu.memory_space<vmem>>, %arg9: memref<8x128xf32, #tpu.memory_space<vmem>>) attributes {dimension_semantics = [#tpu.dimension_semantics<parallel>], iteration_bounds = array<i64: 1>, scalar_prefetch = 0 : i64, scratch_operands = 0 : i64, tpu.core_type = #tpu.core_type<tc>, window_params = [{transform_indices = @transform_0, window_bounds = array<i64: 1>}, {transform_indices = @transform_1, window_bounds = array<i64: 8, 128>}, {pipeline_mode = #tpu.pipeline_mode<synchronous>, transform_indices = @transform_2, window_bounds = array<i64: 128, 128>}, {pipeline_mode = #tpu.pipeline_mode<synchronous>, transform_indices = @transform_3, window_bounds = array<i64: 1, 128>}, {pipeline_mode = #tpu.pipeline_mode<synchronous>, transform_indices = @transform_4, window_bounds = array<i64: 128, 128>}, {pipeline_mode = #tpu.pipeline_mode<synchronous>, transform_indices = @transform_5, window_bounds = array<i64: 1, 128>}, {pipeline_mode = #tpu.pipeline_mode<synchronous>, transform_indices = @transform_6, window_bounds = array<i64: 128, 128>}, {pipeline_mode = #tpu.pipeline_mode<synchronous>, transform_indices = @transform_7, window_bounds = array<i64: 1, 128>}, {transform_indices = @transform_8, window_bounds = array<i64: 8, 128>}]} {
    %c0 = arith.constant 0 : index
    %c0_0 = arith.constant 0 : index
    %0 = vector.load %arg2[%c0, %c0_0] : memref<8x128xbf16, #tpu.memory_space<vmem>>, vector<8x128xbf16>
    %c0_1 = arith.constant 0 : index
    %c0_2 = arith.constant 0 : index
    %1 = vector.load %arg3[%c0_1, %c0_2] : memref<128x128xbf16, #tpu.memory_space<vmem>>, vector<128x128xbf16>
    %cst = arith.constant dense<0.000000e+00> : vector<8x128xf32>
    %2 = tpu.matmul %0, %1, %cst {dimension_numbers = #tpu.dot_dimension_numbers<[1], [0], [0], [1], [0, 0, 1, 1], [], []>} : vector<8x128xbf16>, vector<128x128xbf16>, vector<8x128xf32> -> vector<8x128xf32>
    %c0_3 = arith.constant 0 : index
    %c0_4 = arith.constant 0 : index
    %3 = vector.load %arg4[%c0_3, %c0_4] : memref<1x128xf32, #tpu.memory_space<vmem>>, vector<1x128xf32>
    %4 = vector.broadcast %3 : vector<1x128xf32> to vector<8x128xf32>
    %5 = arith.addf %2, %4 : vector<8x128xf32>
    %cst_5 = arith.constant 0.000000e+00 : f32
    %6 = vector.broadcast %cst_5 : f32 to vector<8x128xf32>
    %7 = arith.maximumf %5, %6 : vector<8x128xf32>
    %8 = arith.truncf %7 : vector<8x128xf32> to vector<8x128xbf16>
    %c0_6 = arith.constant 0 : index
    %c0_7 = arith.constant 0 : index
    %9 = vector.load %arg5[%c0_6, %c0_7] : memref<128x128xbf16, #tpu.memory_space<vmem>>, vector<128x128xbf16>
    %cst_8 = arith.constant dense<0.000000e+00> : vector<8x128xf32>
    %10 = tpu.matmul %8, %9, %cst_8 {dimension_numbers = #tpu.dot_dimension_numbers<[1], [0], [0], [1], [0, 0, 1, 1], [], []>} : vector<8x128xbf16>, vector<128x128xbf16>, vector<8x128xf32> -> vector<8x128xf32>
    %c0_9 = arith.constant 0 : index
    %c0_10 = arith.constant 0 : index
    %11 = vector.load %arg6[%c0_9, %c0_10] : memref<1x128xf32, #tpu.memory_space<vmem>>, vector<1x128xf32>
    %12 = vector.broadcast %11 : vector<1x128xf32> to vector<8x128xf32>
    %13 = arith.addf %10, %12 : vector<8x128xf32>
    %cst_11 = arith.constant 0.000000e+00 : f32
    %14 = vector.broadcast %cst_11 : f32 to vector<8x128xf32>
    %15 = arith.maximumf %13, %14 : vector<8x128xf32>
    %16 = arith.truncf %15 : vector<8x128xf32> to vector<8x128xbf16>
    %c0_12 = arith.constant 0 : index
    %c0_13 = arith.constant 0 : index
    %17 = vector.load %arg7[%c0_12, %c0_13] : memref<128x128xbf16, #tpu.memory_space<vmem>>, vector<128x128xbf16>
    %cst_14 = arith.constant dense<0.000000e+00> : vector<8x128xf32>
    %18 = tpu.matmul %16, %17, %cst_14 {dimension_numbers = #tpu.dot_dimension_numbers<[1], [0], [0], [1], [0, 0, 1, 1], [], []>} : vector<8x128xbf16>, vector<128x128xbf16>, vector<8x128xf32> -> vector<8x128xf32>
    %c0_15 = arith.constant 0 : index
    %c0_16 = arith.constant 0 : index
    %19 = vector.load %arg8[%c0_15, %c0_16] : memref<1x128xf32, #tpu.memory_space<vmem>>, vector<1x128xf32>
    %20 = vector.broadcast %19 : vector<1x128xf32> to vector<8x128xf32>
    %21 = arith.addf %18, %20 : vector<8x128xf32>
    %c0_17 = arith.constant 0 : index
    %c0_18 = arith.constant 0 : index
    %22 = vector.load %arg9[%c0_17, %c0_18] : memref<8x128xf32, #tpu.memory_space<vmem>>, vector<8x128xf32>
    tpu.vector_store %arg9[%c0_17, %c0_18], %21 {strides = array<i32>} : memref<8x128xf32, #tpu.memory_space<vmem>>, vector<8x128xf32>,
    return
  }
  func.func @transform_0(%arg0: i32) -> i32 {
    %c0_i32 = arith.constant 0 : i32
    %c0_i32_0 = arith.constant 0 : i32
    return %c0_i32 : i32
  }
  func.func @transform_1(%arg0: i32) -> (i32, i32) {
    %c0_i32 = arith.constant 0 : i32
    %c0_i32_0 = arith.constant 0 : i32
    return %arg0, %c0_i32 : i32, i32
  }
  func.func @transform_2(%arg0: i32) -> (i32, i32) {
    %c0_i32 = arith.constant 0 : i32
    %c0_i32_0 = arith.constant 0 : i32
    %c0_i32_1 = arith.constant 0 : i32
    return %c0_i32, %c0_i32_0 : i32, i32
  }
  func.func @transform_3(%arg0: i32) -> (i32, i32) {
    %c0_i32 = arith.constant 0 : i32
    %c0_i32_0 = arith.constant 0 : i32
    %c0_i32_1 = arith.constant 0 : i32
    return %c0_i32, %c0_i32_0 : i32, i32
  }
  func.func @transform_4(%arg0: i32) -> (i32, i32) {
    %c0_i32 = arith.constant 0 : i32
    %c0_i32_0 = arith.constant 0 : i32
    %c0_i32_1 = arith.constant 0 : i32
    return %c0_i32, %c0_i32_0 : i32, i32
  }
  func.func @transform_5(%arg0: i32) -> (i32, i32) {
    %c0_i32 = arith.constant 0 : i32
    %c0_i32_0 = arith.constant 0 : i32
    %c0_i32_1 = arith.constant 0 : i32
    return %c0_i32, %c0_i32_0 : i32, i32
  }
  func.func @transform_6(%arg0: i32) -> (i32, i32) {
    %c0_i32 = arith.constant 0 : i32
    %c0_i32_0 = arith.constant 0 : i32
    %c0_i32_1 = arith.constant 0 : i32
    return %c0_i32, %c0_i32_0 : i32, i32
  }
  func.func @transform_7(%arg0: i32) -> (i32, i32) {
    %c0_i32 = arith.constant 0 : i32
    %c0_i32_0 = arith.constant 0 : i32
    %c0_i32_1 = arith.constant 0 : i32
    return %c0_i32, %c0_i32_0 : i32, i32
  }
  func.func @transform_8(%arg0: i32) -> (i32, i32) {
    %c0_i32 = arith.constant 0 : i32
    %c0_i32_0 = arith.constant 0 : i32
    return %arg0, %c0_i32 : i32, i32
  }
}

module attributes {stable_mosaic.version = 11 : i64} {
  func.func @dropout_mlp_kernel_extbits(%arg0: i32, %arg1: memref<8x128xbf16, #tpu.memory_space<vmem>>, %arg2: memref<8x128xi32, #tpu.memory_space<vmem>>, %arg3: memref<8x128xi32, #tpu.memory_space<vmem>>, %arg4: memref<128x128xbf16, #tpu.memory_space<vmem>>, %arg5: memref<1x128xf32, #tpu.memory_space<vmem>>, %arg6: memref<128x128xbf16, #tpu.memory_space<vmem>>, %arg7: memref<1x128xf32, #tpu.memory_space<vmem>>, %arg8: memref<128x128xbf16, #tpu.memory_space<vmem>>, %arg9: memref<1x128xf32, #tpu.memory_space<vmem>>, %arg10: memref<8x128xf32, #tpu.memory_space<vmem>>) attributes {dimension_semantics = [#tpu.dimension_semantics<parallel>], iteration_bounds = array<i64: 1>, scalar_prefetch = 0 : i64, scratch_operands = 0 : i64, tpu.core_type = #tpu.core_type<tc>, window_params = [{transform_indices = @transform_0, window_bounds = array<i64: 8, 128>}, {transform_indices = @transform_1, window_bounds = array<i64: 8, 128>}, {transform_indices = @transform_2, window_bounds = array<i64: 8, 128>}, {pipeline_mode = #tpu.pipeline_mode<synchronous>, transform_indices = @transform_3, window_bounds = array<i64: 128, 128>}, {pipeline_mode = #tpu.pipeline_mode<synchronous>, transform_indices = @transform_4, window_bounds = array<i64: 1, 128>}, {pipeline_mode = #tpu.pipeline_mode<synchronous>, transform_indices = @transform_5, window_bounds = array<i64: 128, 128>}, {pipeline_mode = #tpu.pipeline_mode<synchronous>, transform_indices = @transform_6, window_bounds = array<i64: 1, 128>}, {pipeline_mode = #tpu.pipeline_mode<synchronous>, transform_indices = @transform_7, window_bounds = array<i64: 128, 128>}, {pipeline_mode = #tpu.pipeline_mode<synchronous>, transform_indices = @transform_8, window_bounds = array<i64: 1, 128>}, {transform_indices = @transform_9, window_bounds = array<i64: 8, 128>}]} {
    %c0 = arith.constant 0 : index
    %c0_0 = arith.constant 0 : index
    %0 = vector.load %arg1[%c0, %c0_0] : memref<8x128xbf16, #tpu.memory_space<vmem>>, vector<8x128xbf16>
    %c0_1 = arith.constant 0 : index
    %c0_2 = arith.constant 0 : index
    %1 = vector.load %arg4[%c0_1, %c0_2] : memref<128x128xbf16, #tpu.memory_space<vmem>>, vector<128x128xbf16>
    %cst = arith.constant dense<0.000000e+00> : vector<8x128xf32>
    %2 = tpu.matmul %0, %1, %cst {dimension_numbers = #tpu.dot_dimension_numbers<[1], [0], [0], [1], [0, 0, 1, 1], [], []>} : vector<8x128xbf16>, vector<128x128xbf16>, vector<8x128xf32> -> vector<8x128xf32>
    %c0_3 = arith.constant 0 : index
    %c0_4 = arith.constant 0 : index
    %3 = vector.load %arg5[%c0_3, %c0_4] : memref<1x128xf32, #tpu.memory_space<vmem>>, vector<1x128xf32>
    %4 = vector.broadcast %3 : vector<1x128xf32> to vector<8x128xf32>
    %5 = arith.addf %2, %4 : vector<8x128xf32>
    %cst_5 = arith.constant 0.000000e+00 : f32
    %6 = vector.broadcast %cst_5 : f32 to vector<8x128xf32>
    %7 = arith.maximumf %5, %6 : vector<8x128xf32>
    %8 = arith.truncf %7 : vector<8x128xf32> to vector<8x128xbf16>
    %c0_6 = arith.constant 0 : index
    %c0_7 = arith.constant 0 : index
    %9 = vector.load %arg6[%c0_6, %c0_7] : memref<128x128xbf16, #tpu.memory_space<vmem>>, vector<128x128xbf16>
    %cst_8 = arith.constant dense<0.000000e+00> : vector<8x128xf32>
    %10 = tpu.matmul %8, %9, %cst_8 {dimension_numbers = #tpu.dot_dimension_numbers<[1], [0], [0], [1], [0, 0, 1, 1], [], []>} : vector<8x128xbf16>, vector<128x128xbf16>, vector<8x128xf32> -> vector<8x128xf32>
    %c0_9 = arith.constant 0 : index
    %c0_10 = arith.constant 0 : index
    %11 = vector.load %arg7[%c0_9, %c0_10] : memref<1x128xf32, #tpu.memory_space<vmem>>, vector<1x128xf32>
    %12 = vector.broadcast %11 : vector<1x128xf32> to vector<8x128xf32>
    %13 = arith.addf %10, %12 : vector<8x128xf32>
    %cst_11 = arith.constant 0.000000e+00 : f32
    %14 = vector.broadcast %cst_11 : f32 to vector<8x128xf32>
    %15 = arith.maximumf %13, %14 : vector<8x128xf32>
    %16 = arith.truncf %15 : vector<8x128xf32> to vector<8x128xbf16>
    %c0_12 = arith.constant 0 : index
    %c0_13 = arith.constant 0 : index
    %17 = vector.load %arg8[%c0_12, %c0_13] : memref<128x128xbf16, #tpu.memory_space<vmem>>, vector<128x128xbf16>
    %cst_14 = arith.constant dense<0.000000e+00> : vector<8x128xf32>
    %18 = tpu.matmul %16, %17, %cst_14 {dimension_numbers = #tpu.dot_dimension_numbers<[1], [0], [0], [1], [0, 0, 1, 1], [], []>} : vector<8x128xbf16>, vector<128x128xbf16>, vector<8x128xf32> -> vector<8x128xf32>
    %c0_15 = arith.constant 0 : index
    %c0_16 = arith.constant 0 : index
    %19 = vector.load %arg9[%c0_15, %c0_16] : memref<1x128xf32, #tpu.memory_space<vmem>>, vector<1x128xf32>
    %20 = vector.broadcast %19 : vector<1x128xf32> to vector<8x128xf32>
    %21 = arith.addf %18, %20 : vector<8x128xf32>
    %c0_17 = arith.constant 0 : index
    %c0_18 = arith.constant 0 : index
    %22 = vector.load %arg10[%c0_17, %c0_18] : memref<8x128xf32, #tpu.memory_space<vmem>>, vector<8x128xf32>
    tpu.vector_store %arg10[%c0_17, %c0_18], %21 {strides = array<i32>} : memref<8x128xf32, #tpu.memory_space<vmem>>, vector<8x128xf32>,
    return
  }
  func.func @transform_0(%arg0: i32) -> (i32, i32) {
    %c0_i32 = arith.constant 0 : i32
    %c0_i32_0 = arith.constant 0 : i32
    return %arg0, %c0_i32 : i32, i32
  }
  func.func @transform_1(%arg0: i32) -> (i32, i32) {
    %c0_i32 = arith.constant 0 : i32
    %c0_i32_0 = arith.constant 0 : i32
    return %arg0, %c0_i32 : i32, i32
  }
  func.func @transform_2(%arg0: i32) -> (i32, i32) {
    %c0_i32 = arith.constant 0 : i32
    %c0_i32_0 = arith.constant 0 : i32
    return %arg0, %c0_i32 : i32, i32
  }
  func.func @transform_3(%arg0: i32) -> (i32, i32) {
    %c0_i32 = arith.constant 0 : i32
    %c0_i32_0 = arith.constant 0 : i32
    %c0_i32_1 = arith.constant 0 : i32
    return %c0_i32, %c0_i32_0 : i32, i32
  }
  func.func @transform_4(%arg0: i32) -> (i32, i32) {
    %c0_i32 = arith.constant 0 : i32
    %c0_i32_0 = arith.constant 0 : i32
    %c0_i32_1 = arith.constant 0 : i32
    return %c0_i32, %c0_i32_0 : i32, i32
  }
  func.func @transform_5(%arg0: i32) -> (i32, i32) {
    %c0_i32 = arith.constant 0 : i32
    %c0_i32_0 = arith.constant 0 : i32
    %c0_i32_1 = arith.constant 0 : i32
    return %c0_i32, %c0_i32_0 : i32, i32
  }
  func.func @transform_6(%arg0: i32) -> (i32, i32) {
    %c0_i32 = arith.constant 0 : i32
    %c0_i32_0 = arith.constant 0 : i32
    %c0_i32_1 = arith.constant 0 : i32
    return %c0_i32, %c0_i32_0 : i32, i32
  }
  func.func @transform_7(%arg0: i32) -> (i32, i32) {
    %c0_i32 = arith.constant 0 : i32
    %c0_i32_0 = arith.constant 0 : i32
    %c0_i32_1 = arith.constant 0 : i32
    return %c0_i32, %c0_i32_0 : i32, i32
  }
  func.func @transform_8(%arg0: i32) -> (i32, i32) {
    %c0_i32 = arith.constant 0 : i32
    %c0_i32_0 = arith.constant 0 : i32
    %c0_i32_1 = arith.constant 0 : i32
    return %c0_i32, %c0_i32_0 : i32, i32
  }
  func.func @transform_9(%arg0: i32) -> (i32, i32) {
    %c0_i32 = arith.constant 0 : i32
    %c0_i32_0 = arith.constant 0 : i32
    return %arg0, %c0_i32 : i32, i32
  }
}

module attributes {stable_mosaic.version = 11 : i64} {
  func.func @dropout_mlp_kernel_extbits(%arg0: i32, %arg1: memref<8x128xbf16, #tpu.memory_space<vmem>>, %arg2: memref<8x128xi32, #tpu.memory_space<vmem>>, %arg3: memref<8x128xi32, #tpu.memory_space<vmem>>, %arg4: memref<128x128xbf16, #tpu.memory_space<vmem>>, %arg5: memref<1x128xf32, #tpu.memory_space<vmem>>, %arg6: memref<128x128xbf16, #tpu.memory_space<vmem>>, %arg7: memref<1x128xf32, #tpu.memory_space<vmem>>, %arg8: memref<128x128xbf16, #tpu.memory_space<vmem>>, %arg9: memref<1x128xf32, #tpu.memory_space<vmem>>, %arg10: memref<8x128xf32, #tpu.memory_space<vmem>>) attributes {dimension_semantics = [#tpu.dimension_semantics<parallel>], iteration_bounds = array<i64: 1>, scalar_prefetch = 0 : i64, scratch_operands = 0 : i64, tpu.core_type = #tpu.core_type<tc>, window_params = [{transform_indices = @transform_0, window_bounds = array<i64: 8, 128>}, {transform_indices = @transform_1, window_bounds = array<i64: 8, 128>}, {transform_indices = @transform_2, window_bounds = array<i64: 8, 128>}, {pipeline_mode = #tpu.pipeline_mode<synchronous>, transform_indices = @transform_3, window_bounds = array<i64: 128, 128>}, {pipeline_mode = #tpu.pipeline_mode<synchronous>, transform_indices = @transform_4, window_bounds = array<i64: 1, 128>}, {pipeline_mode = #tpu.pipeline_mode<synchronous>, transform_indices = @transform_5, window_bounds = array<i64: 128, 128>}, {pipeline_mode = #tpu.pipeline_mode<synchronous>, transform_indices = @transform_6, window_bounds = array<i64: 1, 128>}, {pipeline_mode = #tpu.pipeline_mode<synchronous>, transform_indices = @transform_7, window_bounds = array<i64: 128, 128>}, {pipeline_mode = #tpu.pipeline_mode<synchronous>, transform_indices = @transform_8, window_bounds = array<i64: 1, 128>}, {transform_indices = @transform_9, window_bounds = array<i64: 8, 128>}]} {
    %c0 = arith.constant 0 : index
    %c0_0 = arith.constant 0 : index
    %0 = vector.load %arg1[%c0, %c0_0] : memref<8x128xbf16, #tpu.memory_space<vmem>>, vector<8x128xbf16>
    %c0_1 = arith.constant 0 : index
    %c0_2 = arith.constant 0 : index
    %1 = vector.load %arg4[%c0_1, %c0_2] : memref<128x128xbf16, #tpu.memory_space<vmem>>, vector<128x128xbf16>
    %cst = arith.constant dense<0.000000e+00> : vector<8x128xf32>
    %2 = tpu.matmul %0, %1, %cst {dimension_numbers = #tpu.dot_dimension_numbers<[1], [0], [0], [1], [0, 0, 1, 1], [], []>} : vector<8x128xbf16>, vector<128x128xbf16>, vector<8x128xf32> -> vector<8x128xf32>
    %c0_3 = arith.constant 0 : index
    %c0_4 = arith.constant 0 : index
    %3 = vector.load %arg5[%c0_3, %c0_4] : memref<1x128xf32, #tpu.memory_space<vmem>>, vector<1x128xf32>
    %4 = vector.broadcast %3 : vector<1x128xf32> to vector<8x128xf32>
    %5 = arith.addf %2, %4 : vector<8x128xf32>
    %cst_5 = arith.constant 0.000000e+00 : f32
    %6 = vector.broadcast %cst_5 : f32 to vector<8x128xf32>
    %7 = arith.maximumf %5, %6 : vector<8x128xf32>
    %8 = arith.truncf %7 : vector<8x128xf32> to vector<8x128xbf16>
    %c0_6 = arith.constant 0 : index
    %c0_7 = arith.constant 0 : index
    %9 = vector.load %arg6[%c0_6, %c0_7] : memref<128x128xbf16, #tpu.memory_space<vmem>>, vector<128x128xbf16>
    %cst_8 = arith.constant dense<0.000000e+00> : vector<8x128xf32>
    %10 = tpu.matmul %8, %9, %cst_8 {dimension_numbers = #tpu.dot_dimension_numbers<[1], [0], [0], [1], [0, 0, 1, 1], [], []>} : vector<8x128xbf16>, vector<128x128xbf16>, vector<8x128xf32> -> vector<8x128xf32>
    %c0_9 = arith.constant 0 : index
    %c0_10 = arith.constant 0 : index
    %11 = vector.load %arg7[%c0_9, %c0_10] : memref<1x128xf32, #tpu.memory_space<vmem>>, vector<1x128xf32>
    %12 = vector.broadcast %11 : vector<1x128xf32> to vector<8x128xf32>
    %13 = arith.addf %10, %12 : vector<8x128xf32>
    %cst_11 = arith.constant 0.000000e+00 : f32
    %14 = vector.broadcast %cst_11 : f32 to vector<8x128xf32>
    %15 = arith.maximumf %13, %14 : vector<8x128xf32>
    %16 = arith.truncf %15 : vector<8x128xf32> to vector<8x128xbf16>
    %c0_12 = arith.constant 0 : index
    %c0_13 = arith.constant 0 : index
    %17 = vector.load %arg8[%c0_12, %c0_13] : memref<128x128xbf16, #tpu.memory_space<vmem>>, vector<128x128xbf16>
    %cst_14 = arith.constant dense<0.000000e+00> : vector<8x128xf32>
    %18 = tpu.matmul %16, %17, %cst_14 {dimension_numbers = #tpu.dot_dimension_numbers<[1], [0], [0], [1], [0, 0, 1, 1], [], []>} : vector<8x128xbf16>, vector<128x128xbf16>, vector<8x128xf32> -> vector<8x128xf32>
    %c0_15 = arith.constant 0 : index
    %c0_16 = arith.constant 0 : index
    %19 = vector.load %arg9[%c0_15, %c0_16] : memref<1x128xf32, #tpu.memory_space<vmem>>, vector<1x128xf32>
    %20 = vector.broadcast %19 : vector<1x128xf32> to vector<8x128xf32>
    %21 = arith.addf %18, %20 : vector<8x128xf32>
    %c0_17 = arith.constant 0 : index
    %c0_18 = arith.constant 0 : index
    %22 = vector.load %arg10[%c0_17, %c0_18] : memref<8x128xf32, #tpu.memory_space<vmem>>, vector<8x128xf32>
    tpu.vector_store %arg10[%c0_17, %c0_18], %21 {strides = array<i32>} : memref<8x128xf32, #tpu.memory_space<vmem>>, vector<8x128xf32>,
    return
  }
  func.func @transform_0(%arg0: i32) -> (i32, i32) {
    %c0_i32 = arith.constant 0 : i32
    %c0_i32_0 = arith.constant 0 : i32
    return %arg0, %c0_i32 : i32, i32
  }
  func.func @transform_1(%arg0: i32) -> (i32, i32) {
    %c0_i32 = arith.constant 0 : i32
    %c0_i32_0 = arith.constant 0 : i32
    return %arg0, %c0_i32 : i32, i32
  }
  func.func @transform_2(%arg0: i32) -> (i32, i32) {
    %c0_i32 = arith.constant 0 : i32
    %c0_i32_0 = arith.constant 0 : i32
    return %arg0, %c0_i32 : i32, i32
  }
  func.func @transform_3(%arg0: i32) -> (i32, i32) {
    %c0_i32 = arith.constant 0 : i32
    %c0_i32_0 = arith.constant 0 : i32
    %c0_i32_1 = arith.constant 0 : i32
    return %c0_i32, %c0_i32_0 : i32, i32
  }
  func.func @transform_4(%arg0: i32) -> (i32, i32) {
    %c0_i32 = arith.constant 0 : i32
    %c0_i32_0 = arith.constant 0 : i32
    %c0_i32_1 = arith.constant 0 : i32
    return %c0_i32, %c0_i32_0 : i32, i32
  }
  func.func @transform_5(%arg0: i32) -> (i32, i32) {
    %c0_i32 = arith.constant 0 : i32
    %c0_i32_0 = arith.constant 0 : i32
    %c0_i32_1 = arith.constant 0 : i32
    return %c0_i32, %c0_i32_0 : i32, i32
  }
  func.func @transform_6(%arg0: i32) -> (i32, i32) {
    %c0_i32 = arith.constant 0 : i32
    %c0_i32_0 = arith.constant 0 : i32
    %c0_i32_1 = arith.constant 0 : i32
    return %c0_i32, %c0_i32_0 : i32, i32
  }
  func.func @transform_7(%arg0: i32) -> (i32, i32) {
    %c0_i32 = arith.constant 0 : i32
    %c0_i32_0 = arith.constant 0 : i32
    %c0_i32_1 = arith.constant 0 : i32
    return %c0_i32, %c0_i32_0 : i32, i32
  }
  func.func @transform_8(%arg0: i32) -> (i32, i32) {
    %c0_i32 = arith.constant 0 : i32
    %c0_i32_0 = arith.constant 0 : i32
    %c0_i32_1 = arith.constant 0 : i32
    return %c0_i32, %c0_i32_0 : i32, i32
  }
  func.func @transform_9(%arg0: i32) -> (i32, i32) {
    %c0_i32 = arith.constant 0 : i32
    %c0_i32_0 = arith.constant 0 : i32
    return %arg0, %c0_i32 : i32, i32
  }
}

</mosaic_0001>

<bundles_post_ra>
// kernel: tpu_custom_call.1
= control target key start
LH: loop header
LB: loop body
LE: loop exit
PB: predicated region body
PF: predicated region fallthrough
CT: control target
= control target key end

     0   :  { %14 = vsyncpa [#allocation4], 0  ;;  %s868_s0 = inlined_call_operand.<no memory space> [shape: s32[1], index: 0, kind: input, shape index: {}]   ;;  %s869_s1 = inlined_call_operand.hbm [shape: bf16[8,128], index: 1, kind: input, shape index: {}]   ;;  %s870_s2 = inlined_call_operand.hbm [shape: bf16[128,128], index: 2, kind: input, shape index: {}]   ;;  %s871_s3 = inlined_call_operand.vmem [shape: f32[1,128], index: 3, kind: input, shape index: {}]   ;;  %s872_s4 = inlined_call_operand.hbm [shape: bf16[128,128], index: 4, kind: input, shape index: {}]   ;;  %s873_s5 = inlined_call_operand.vmem [shape: f32[1,128], index: 5, kind: input, shape index: {}]   ;;  %s874_s6 = inlined_call_operand.hbm [shape: bf16[128,128], index: 6, kind: input, shape index: {}]   ;;  %s875_s7 = inlined_call_operand.vmem [shape: f32[1,128], index: 7, kind: input, shape index: {}]   ;;  %s876_s8 = inlined_call_operand.hbm [shape: f32[8,128], index: 8, kind: output, shape index: {}]  }
   0x1   :  { %15 = vsyncpa [#allocation7], 0 }
   0x2   :  { %16 = vsyncpa [#allocation10], 0 }
   0x3   :  { %17 = vsyncpa [#allocation5], 0  ;;  %s706_s26 = smov [#allocation6]   ;;  %s588_s30 = scalar_lea.hbm %s870_s2, 1024 }
   0x4   :  { %s35_s27 = sshll.u32 %s706_s26, 4  ;;  %p589_p0 = scmp.ne.s32.totalorder %s870_s2, %s588_s30  ;;  %s36_s27 = int_to_ptr.vmem [resolvable:$true] %s35_s27 }
   0x5   :  { %p592_p1 = scmp.lt.u32.totalorder %s588_s30, %s870_s2 }
   0x7   :  { %p594_p2 = pnand %p592_p1, %p589_p0 }
   0x9   :  { %597 = shalt.err (!%p594_p2)
}
   0xa   :  { %s598_s13 = scalar_lea.vmem %s36_s27, 1024  ;;  %p603_p4 = scmp.lt.s32.totalorder %s36_s27, %s36_s27 }
   0xb   :  { %p599_p3 = scmp.ne.s32.totalorder %s36_s27, %s598_s13  ;;  %p604_p5 = scmp.lt.s32.totalorder %s598_s13, %s598_s13 }
   0xd   :  { %p605_p6 = por %p604_p5, %p603_p4 }
   0xf   :  { %p606_p7 = pnand %p605_p6, %p599_p3 }
  0x11   :  { %609 = shalt.err (!%p606_p7)
}
  0x12   :  { %s707_s14 = smov 64   ;;  %s708_s15 = smov 4  }
  0x13   :  { %41 = dma.hbm_to_vmem [thread:$0]  %s870_s2, 1024, %s36_s27, [#allocation7], %s707_s14, %s707_s14, %s708_s15  }
  0x14   :  { %s709_s18 = smov [#allocation3]   ;;  %s710_s20 = smov [#allocation8]  }
  0x15   :  { %s26_s19 = sshll.u32 %s709_s18, 4  ;;  %s49_s21 = sshll.u32 %s710_s20, 4  ;;  %s27_s19 = int_to_ptr.vmem [resolvable:$true] %s26_s19  ;;  %s50_s21 = int_to_ptr.vmem [resolvable:$true] %s49_s21 }
  0x16   :  { %s610_s0 = scalar_lea.hbm %s869_s1, 64 }
  0x17   :  { %p611_p8 = scmp.ne.s32.totalorder %s869_s1, %s610_s0  ;;  %p614_p9 = scmp.lt.u32.totalorder %s610_s0, %s869_s1 }
  0x19   :  { %p616_p10 = pnand %p614_p9, %p611_p8 }
  0x1b   :  { %619 = shalt.err (!%p616_p10)
}
  0x1c   :  { %s620_s2 = scalar_lea.vmem %s27_s19, 64  ;;  %p625_p12 = scmp.lt.s32.totalorder %s27_s19, %s27_s19 }
  0x1d   :  { %p621_p11 = scmp.ne.s32.totalorder %s27_s19, %s620_s2  ;;  %p626_p13 = scmp.lt.s32.totalorder %s620_s2, %s620_s2 }
  0x1f   :  { %p627_p0 = por %p626_p13, %p625_p12 }
  0x21   :  { %p628_p1 = pnand %p627_p0, %p621_p11 }
  0x23   :  { %631 = shalt.err (!%p628_p1)
}
  0x24   :  { %29 = dma.hbm_to_vmem [thread:$0]  %s869_s1, 64, %s27_s19, [#allocation4]  }
  0x25   :  { %s632_s10 = scalar_lea.hbm %s872_s4, 1024 }
  0x26   :  { %p633_p2 = scmp.ne.s32.totalorder %s872_s4, %s632_s10  ;;  %p636_p3 = scmp.lt.u32.totalorder %s632_s10, %s872_s4 }
  0x28   :  { %p638_p4 = pnand %p636_p3, %p633_p2 }
  0x2a   :  { %641 = shalt.err (!%p638_p4)
}
  0x2b   :  { %s642_s17 = scalar_lea.vmem %s50_s21, 1024  ;;  %p647_p6 = scmp.lt.s32.totalorder %s50_s21, %s50_s21 }
  0x2c   :  { %p643_p5 = scmp.ne.s32.totalorder %s50_s21, %s642_s17  ;;  %p648_p7 = scmp.lt.s32.totalorder %s642_s17, %s642_s17 }
  0x2e   :  { %p649_p8 = por %p648_p7, %p647_p6 }
  0x30   :  { %p650_p9 = pnand %p649_p8, %p643_p5 }
  0x32   :  { %653 = shalt.err (!%p650_p9)
}
  0x33   :  { %55 = dma.hbm_to_vmem [thread:$0]  %s872_s4, 1024, %s50_s21, [#allocation7], %s707_s14, %s707_s14, %s708_s15  }
  0x34   :  { %s711_s19 = smov [#allocation9]   ;;  %s654_s0 = scalar_lea.hbm %s874_s6, 1024 }
  0x35   :  { %s63_s20 = sshll.u32 %s711_s19, 4  ;;  %p655_p10 = scmp.ne.s32.totalorder %s874_s6, %s654_s0  ;;  %s64_s20 = int_to_ptr.vmem [resolvable:$true] %s63_s20 }
  0x36   :  { %p658_p11 = scmp.lt.u32.totalorder %s654_s0, %s874_s6 }
  0x38   :  { %p660_p12 = pnand %p658_p11, %p655_p10 }
  0x3a   :  { %663 = shalt.err (!%p660_p12)
}
  0x3b   :  { %s664_s2 = scalar_lea.vmem %s64_s20, 1024  ;;  %p669_p0 = scmp.lt.s32.totalorder %s64_s20, %s64_s20 }
  0x3c   :  { %p665_p13 = scmp.ne.s32.totalorder %s64_s20, %s664_s2  ;;  %p670_p1 = scmp.lt.s32.totalorder %s664_s2, %s664_s2 }
  0x3e   :  { %p671_p2 = por %p670_p1, %p669_p0 }
  0x40   :  { %p672_p3 = pnand %p671_p2, %p665_p13 }
  0x42   :  { %675 = shalt.err (!%p672_p3)
}
  0x43   :  { %69 = dma.hbm_to_vmem [thread:$0]  %s874_s6, 1024, %s64_s20, [#allocation10], %s707_s14, %s707_s14, %s708_s15  }
  0x44   :  { %698 = dma.done.wait [#allocation4], 64  }
  0x45   :  { %699 = vsyncadd [#allocation4], 4294967232 }
  0x46   :  { %700 = dma.done.wait [#allocation7], 2048  }
  0x47   :  { %701 = vsyncadd [#allocation7], 4294965248 }
  0x48   :  { %702 = dma.done.wait [#allocation10], 1024  }
  0x49   :  { %703 = vsyncadd [#allocation10], 4294966272  ;;  %v712_v0 = vmov 0.0   ;;  %vm713_vm0 = vmmov 0   ;;  %v564_v1 = vld [vmem:[#allocation6] sm:$0xff]   ;;  %v565_v2 = vld [vmem:[#allocation6 + $0x8] sm:$0xff]  }
  0x4a   :  { %495 = vmatprep.subr.bf16.mxu0 %v712_v0  ;;  %511 = vmatprep.mubr.msk.bf16.mxu0 %vm713_vm0, %v712_v0  ;;  %v566_v3 = vld [vmem:[#allocation6 + $0x10] sm:$0xff]   ;;  %v572_v4 = vld [vmem:[#allocation8] sm:$0xff]   ;;  %v567_v5 = vld [vmem:[#allocation6 + $0x18] sm:$0xff]   ;;  %s714_s30 = smov [#allocation11]  }
  0x4b   :  { %515 = vmatprep.subr.bf16.mxu1 %v712_v0  ;;  %531 = vmatprep.mubr.msk.bf16.mxu1 %vm713_vm0, %v712_v0  ;;  %v573_v6 = vld [vmem:[#allocation8 + $0x8] sm:$0xff]   ;;  %v568_v7 = vld [vmem:[#allocation6 + $0x20] sm:$0xff]   ;;  %v574_v8 = vld [vmem:[#allocation8 + $0x10] sm:$0xff]   ;;  %s430_s9 = sshll.u32 %s714_s30, 4  ;;  %s431_s9 = int_to_ptr.vmem [resolvable:$true] %s430_s9 }
  0x4c   :  { %496 = vmatpush3.bf16.msra.mxu0 %v564_v1  ;;  %516 = vmatpush3.bf16.msra.mxu1 %v572_v4  ;;  %v569_v9 = vld [vmem:[#allocation6 + $0x28] sm:$0xff]   ;;  %v575_v10 = vld [vmem:[#allocation8 + $0x18] sm:$0xff]   ;;  %v570_v11 = vld [vmem:[#allocation6 + $0x30] sm:$0xff]   ;;  %p681_p5 = scmp.lt.s32.totalorder %s431_s9, %s431_s9 }
  0x4d   :  { %497 = vmatprep.subr.bf16.mxu0 %v712_v0  ;;  %517 = vmatprep.subr.bf16.mxu1 %v712_v0  ;;  %v576_v12 = vld [vmem:[#allocation8 + $0x20] sm:$0xff]   ;;  %v571_v13 = vld [vmem:[#allocation6 + $0x38] sm:$0xff]   ;;  %v577_v14 = vld [vmem:[#allocation8 + $0x28] sm:$0xff]  }
  0x4e   :  { %v85_v15 = vld [vmem:[#allocation3] sm:$0xf]  ;;  %v578_v16 = vld [vmem:[#allocation8 + $0x30] sm:$0xff]   ;;  %v580_v18 = vld [vmem:[#allocation9] sm:$0xff]  }
  0x4f   :  { %v579_v17 = vld [vmem:[#allocation8 + $0x38] sm:$0xff]   ;;  %v581_v19 = vld [vmem:[#allocation9 + $0x8] sm:$0xff]   ;;  %v582_v20 = vld [vmem:[#allocation9 + $0x10] sm:$0xff]  }
  0x50   :  { %498 = vmatpush3.bf16.msra.mxu0 %v565_v2  ;;  %518 = vmatpush3.bf16.msra.mxu1 %v573_v6  ;;  %v583_v21 = vld [vmem:[#allocation9 + $0x18] sm:$0xff]   ;;  %v584_v22 = vld [vmem:[#allocation9 + $0x20] sm:$0xff]   ;;  %v585_v23 = vld [vmem:[#allocation9 + $0x28] sm:$0xff]  }
  0x51   :  { %499 = vmatprep.subr.bf16.mxu0 %v712_v0  ;;  %519 = vmatprep.subr.bf16.mxu1 %v712_v0  ;;  %v441_v24 = vld [vmem:[%s871_s3] ss:$0 sm:$0xff]  ;;  %v586_v32 = vld [vmem:[#allocation9 + $0x30] sm:$0xff]  }
  0x52   :  { %v587_v33 = vld [vmem:[#allocation9 + $0x38] sm:$0xff]  }
  0x53   :  { %v450_v34 = vld [vmem:[%s873_s5] ss:$0 sm:$0xff]  ;;  %s676_s5 = scalar_lea.vmem %s431_s9, 128 }
  0x54   :  { %500 = vmatpush3.bf16.msra.mxu0 %v566_v3  ;;  %520 = vmatpush3.bf16.msra.mxu1 %v574_v8  ;;  %v459_v42 = vld [vmem:[%s875_s7] ss:$0 sm:$0xff]  ;;  %p677_p4 = scmp.ne.s32.totalorder %s431_s9, %s676_s5  ;;  %p682_p6 = scmp.lt.s32.totalorder %s676_s5, %s676_s5 }
  0x55   :  { %501 = vmatprep.subr.bf16.mxu0 %v712_v0  ;;  %521 = vmatprep.subr.bf16.mxu1 %v712_v0 }
  0x56   :  { %p683_p7 = por %p682_p6, %p681_p5 }
  0x58   :  { %502 = vmatpush3.bf16.msra.mxu0 %v567_v5  ;;  %522 = vmatpush3.bf16.msra.mxu1 %v575_v10  ;;  %p684_p8 = pnand %p683_p7, %p677_p4 }
  0x59   :  { %503 = vmatprep.subr.bf16.mxu0 %v712_v0  ;;  %523 = vmatprep.subr.bf16.mxu1 %v712_v0 }
  0x5c   :  { %504 = vmatpush3.bf16.msra.mxu0 %v568_v7  ;;  %524 = vmatpush3.bf16.msra.mxu1 %v576_v12 }
  0x5d   :  { %505 = vmatprep.subr.bf16.mxu0 %v712_v0  ;;  %525 = vmatprep.subr.bf16.mxu1 %v712_v0 }
  0x60   :  { %506 = vmatpush3.bf16.msra.mxu0 %v569_v9  ;;  %526 = vmatpush3.bf16.msra.mxu1 %v577_v14 }
  0x61   :  { %507 = vmatprep.subr.bf16.mxu0 %v712_v0  ;;  %527 = vmatprep.subr.bf16.mxu1 %v712_v0 }
  0x64   :  { %508 = vmatpush3.bf16.msra.mxu0 %v570_v11  ;;  %528 = vmatpush3.bf16.msra.mxu1 %v578_v16 }
  0x65   :  { %509 = vmatprep.subr.bf16.mxu0 %v712_v0  ;;  %529 = vmatprep.subr.bf16.mxu1 %v712_v0 }
  0x68   :  { %510 = vmatpush3.bf16.msra.mxu0 %v571_v13  ;;  %530 = vmatpush3.bf16.msra.mxu1 %v579_v17 }
  0x69   :  { %535 = vmatprep.subr.bf16.mxu0 %v712_v0 }
  0x6b   :  { %512 = vmatmul.mubr.bf16.vlgmr.msra.gmra.mrb[0].mxu0 %v85_v15 }
  0x6c   :  { %551 = vmatprep.mubr.msk.bf16.mxu0 %vm713_vm0, %v712_v0  ;;  %536 = vmatpush3.bf16.msra.mxu0 %v580_v18 }
  0x6d   :  { %537 = vmatprep.subr.bf16.mxu0 %v712_v0 }
  0x70   :  { %538 = vmatpush3.bf16.msra.mxu0 %v581_v19 }
  0x71   :  { %539 = vmatprep.subr.bf16.mxu0 %v712_v0 }
  0x74   :  { %540 = vmatpush3.bf16.msra.mxu0 %v582_v20 }
  0x75   :  { %541 = vmatprep.subr.bf16.mxu0 %v712_v0 }
  0x78   :  { %542 = vmatpush3.bf16.msra.mxu0 %v583_v21 }
  0x79   :  { %543 = vmatprep.subr.bf16.mxu0 %v712_v0 }
  0x7c   :  { %544 = vmatpush3.bf16.msra.mxu0 %v584_v22 }
  0x7d   :  { %545 = vmatprep.subr.bf16.mxu0 %v712_v0 }
  0x80   :  { %546 = vmatpush3.bf16.msra.mxu0 %v585_v23 }
  0x81   :  { %547 = vmatprep.subr.bf16.mxu0 %v712_v0 }
  0x84   :  { %548 = vmatpush3.bf16.msra.mxu0 %v586_v32 }
  0x85   :  { %549 = vmatprep.subr.bf16.mxu0 %v712_v0 }
  0x88   :  { %550 = vmatpush3.bf16.msra.mxu0 %v587_v33 }
 0x13e   :  { %v191_v25 = vpop.f32.mrb[0].mxu0 }
 0x13f   :  { %v192_v26 = vadd.f32 %v441_v24, %v191_v25  ;;  %v513_v27 = vpop.f32.mrb[1].mxu0 }
 0x140   :  { %v194_v28 = vpop.f32.mrb[2].mxu0 }
 0x141   :  { %v197_v29 = vmax.f32 %v192_v26, 0.0  ;;  %v514_v30 = vpop.f32.mrb[3].mxu0 }
 0x143   :  { %v198_v31 = vpack.c.bf16 %v197_v29, %v197_v29 }
 0x145   :  { %532 = vmatmul.mubr.bf16.vlgmr.msra.gmra.mrb[0].mxu1 %v198_v31 }
 0x218   :  { %v304_v35 = vpop.f32.mrb[0].mxu1 }
 0x219   :  { %v305_v36 = vadd.f32 %v450_v34, %v304_v35  ;;  %v533_v37 = vpop.f32.mrb[1].mxu1 }
 0x21a   :  { %v307_v38 = vpop.f32.mrb[2].mxu1 }
 0x21b   :  { %v310_v39 = vmax.f32 %v305_v36, 0.0  ;;  %v534_v40 = vpop.f32.mrb[3].mxu1 }
 0x21d   :  { %v311_v41 = vpack.c.bf16 %v310_v39, %v310_v39 }
 0x21f   :  { %552 = vmatmul.mubr.bf16.vlgmr.msra.gmra.mrb[4].mxu0 %v311_v41 }
 0x2f2   :  { %v417_v43 = vpop.f32.mrb[4].mxu0 }
 0x2f3   :  { %v418_v44 = vadd.f32 %v459_v42, %v417_v43  ;;  %v553_v45 = vpop.f32.mrb[5].mxu0 }
 0x2f4   :  { %v420_v46 = vpop.f32.mrb[6].mxu0 }
 0x2f5   :  { %423 = vst [vmem:[#allocation11] sm:$0xff] %v418_v44  ;;  %v554_v47 = vpop.f32.mrb[7].mxu0 }
 0x2f6   :  { %687 = shalt.err (!%p684_p8)
}
 0x2f7   :  { %s688_s7 = scalar_lea.hbm %s876_s8, 128 }
 0x2f8   :  { %p689_p9 = scmp.ne.s32.totalorder %s876_s8, %s688_s7  ;;  %p692_p10 = scmp.lt.u32.totalorder %s688_s7, %s876_s8 }
 0x2fa   :  { %p694_p11 = pnand %p692_p10, %p689_p9 }
 0x2fc   :  { %697 = shalt.err (!%p694_p11)
}
 0x2fd   :  { %433 = dma.vmem_to_hbm [thread:$0]  %s431_s9, 128, %s876_s8, [#allocation5]  }
 0x2fe   :  { %704 = dma.done.wait [#allocation5], 128  }
 0x2ff   :  { %705 = vsyncadd [#allocation5], 4294967168 }
 0x300   :  { %437 = vsyncpa [#allocation4], 1 }
 0x301   :  { %438 = vsyncpa [#allocation7], 1 }
 0x302   :  { %439 = vsyncpa [#allocation10], 1 }
 0x303   :  { %440 = vsyncpa [#allocation5], 1 }

// kernel: tpu_custom_call.1
= control target key start
LH: loop header
LB: loop body
LE: loop exit
PB: predicated region body
PF: predicated region fallthrough
CT: control target
= control target key end

     0   :  { %14 = vsyncpa [#allocation4], 0  ;;  %s868_s0 = inlined_call_operand.<no memory space> [shape: s32[1], index: 0, kind: input, shape index: {}]   ;;  %s869_s1 = inlined_call_operand.hbm [shape: bf16[8,128], index: 1, kind: input, shape index: {}]   ;;  %s870_s2 = inlined_call_operand.hbm [shape: bf16[128,128], index: 2, kind: input, shape index: {}]   ;;  %s871_s3 = inlined_call_operand.vmem [shape: f32[1,128], index: 3, kind: input, shape index: {}]   ;;  %s872_s4 = inlined_call_operand.hbm [shape: bf16[128,128], index: 4, kind: input, shape index: {}]   ;;  %s873_s5 = inlined_call_operand.vmem [shape: f32[1,128], index: 5, kind: input, shape index: {}]   ;;  %s874_s6 = inlined_call_operand.hbm [shape: bf16[128,128], index: 6, kind: input, shape index: {}]   ;;  %s875_s7 = inlined_call_operand.vmem [shape: f32[1,128], index: 7, kind: input, shape index: {}]   ;;  %s876_s8 = inlined_call_operand.hbm [shape: f32[8,128], index: 8, kind: output, shape index: {}]  }
   0x1   :  { %15 = vsyncpa [#allocation7], 0 }
   0x2   :  { %16 = vsyncpa [#allocation10], 0 }
   0x3   :  { %17 = vsyncpa [#allocation5], 0  ;;  %s706_s26 = smov [#allocation6]   ;;  %s588_s30 = scalar_lea.hbm %s870_s2, 1024 }
   0x4   :  { %s35_s27 = sshll.u32 %s706_s26, 4  ;;  %p589_p0 = scmp.ne.s32.totalorder %s870_s2, %s588_s30  ;;  %s36_s27 = int_to_ptr.vmem [resolvable:$true] %s35_s27 }
   0x5   :  { %p592_p1 = scmp.lt.u32.totalorder %s588_s30, %s870_s2 }
   0x7   :  { %p594_p2 = pnand %p592_p1, %p589_p0 }
   0x9   :  { %597 = shalt.err (!%p594_p2)
}
   0xa   :  { %s598_s13 = scalar_lea.vmem %s36_s27, 1024  ;;  %p603_p4 = scmp.lt.s32.totalorder %s36_s27, %s36_s27 }
   0xb   :  { %p599_p3 = scmp.ne.s32.totalorder %s36_s27, %s598_s13  ;;  %p604_p5 = scmp.lt.s32.totalorder %s598_s13, %s598_s13 }
   0xd   :  { %p605_p6 = por %p604_p5, %p603_p4 }
   0xf   :  { %p606_p7 = pnand %p605_p6, %p599_p3 }
  0x11   :  { %609 = shalt.err (!%p606_p7)
}
  0x12   :  { %s707_s14 = smov 64   ;;  %s708_s15 = smov 4  }
  0x13   :  { %41 = dma.hbm_to_vmem [thread:$0]  %s870_s2, 1024, %s36_s27, [#allocation7], %s707_s14, %s707_s14, %s708_s15  }
  0x14   :  { %s709_s18 = smov [#allocation3]   ;;  %s710_s20 = smov [#allocation8]  }
  0x15   :  { %s26_s19 = sshll.u32 %s709_s18, 4  ;;  %s49_s21 = sshll.u32 %s710_s20, 4  ;;  %s27_s19 = int_to_ptr.vmem [resolvable:$true] %s26_s19  ;;  %s50_s21 = int_to_ptr.vmem [resolvable:$true] %s49_s21 }
  0x16   :  { %s610_s0 = scalar_lea.hbm %s869_s1, 64 }
  0x17   :  { %p611_p8 = scmp.ne.s32.totalorder %s869_s1, %s610_s0  ;;  %p614_p9 = scmp.lt.u32.totalorder %s610_s0, %s869_s1 }
  0x19   :  { %p616_p10 = pnand %p614_p9, %p611_p8 }
  0x1b   :  { %619 = shalt.err (!%p616_p10)
}
  0x1c   :  { %s620_s2 = scalar_lea.vmem %s27_s19, 64  ;;  %p625_p12 = scmp.lt.s32.totalorder %s27_s19, %s27_s19 }
  0x1d   :  { %p621_p11 = scmp.ne.s32.totalorder %s27_s19, %s620_s2  ;;  %p626_p13 = scmp.lt.s32.totalorder %s620_s2, %s620_s2 }
  0x1f   :  { %p627_p0 = por %p626_p13, %p625_p12 }
  0x21   :  { %p628_p1 = pnand %p627_p0, %p621_p11 }
  0x23   :  { %631 = shalt.err (!%p628_p1)
}
  0x24   :  { %29 = dma.hbm_to_vmem [thread:$0]  %s869_s1, 64, %s27_s19, [#allocation4]  }
  0x25   :  { %s632_s10 = scalar_lea.hbm %s872_s4, 1024 }
  0x26   :  { %p633_p2 = scmp.ne.s32.totalorder %s872_s4, %s632_s10  ;;  %p636_p3 = scmp.lt.u32.totalorder %s632_s10, %s872_s4 }
  0x28   :  { %p638_p4 = pnand %p636_p3, %p633_p2 }
  0x2a   :  { %641 = shalt.err (!%p638_p4)
}
  0x2b   :  { %s642_s17 = scalar_lea.vmem %s50_s21, 1024  ;;  %p647_p6 = scmp.lt.s32.totalorder %s50_s21, %s50_s21 }
  0x2c   :  { %p643_p5 = scmp.ne.s32.totalorder %s50_s21, %s642_s17  ;;  %p648_p7 = scmp.lt.s32.totalorder %s642_s17, %s642_s17 }
  0x2e   :  { %p649_p8 = por %p648_p7, %p647_p6 }
  0x30   :  { %p650_p9 = pnand %p649_p8, %p643_p5 }
  0x32   :  { %653 = shalt.err (!%p650_p9)
}
  0x33   :  { %55 = dma.hbm_to_vmem [thread:$0]  %s872_s4, 1024, %s50_s21, [#allocation7], %s707_s14, %s707_s14, %s708_s15  }
  0x34   :  { %s711_s19 = smov [#allocation9]   ;;  %s654_s0 = scalar_lea.hbm %s874_s6, 1024 }
  0x35   :  { %s63_s20 = sshll.u32 %s711_s19, 4  ;;  %p655_p10 = scmp.ne.s32.totalorder %s874_s6, %s654_s0  ;;  %s64_s20 = int_to_ptr.vmem [resolvable:$true] %s63_s20 }
  0x36   :  { %p658_p11 = scmp.lt.u32.totalorder %s654_s0, %s874_s6 }
  0x38   :  { %p660_p12 = pnand %p658_p11, %p655_p10 }
  0x3a   :  { %663 = shalt.err (!%p660_p12)
}
  0x3b   :  { %s664_s2 = scalar_lea.vmem %s64_s20, 1024  ;;  %p669_p0 = scmp.lt.s32.totalorder %s64_s20, %s64_s20 }
  0x3c   :  { %p665_p13 = scmp.ne.s32.totalorder %s64_s20, %s664_s2  ;;  %p670_p1 = scmp.lt.s32.totalorder %s664_s2, %s664_s2 }
  0x3e   :  { %p671_p2 = por %p670_p1, %p669_p0 }
  0x40   :  { %p672_p3 = pnand %p671_p2, %p665_p13 }
  0x42   :  { %675 = shalt.err (!%p672_p3)
}
  0x43   :  { %69 = dma.hbm_to_vmem [thread:$0]  %s874_s6, 1024, %s64_s20, [#allocation10], %s707_s14, %s707_s14, %s708_s15  }
  0x44   :  { %698 = dma.done.wait [#allocation4], 64  }
  0x45   :  { %699 = vsyncadd [#allocation4], 4294967232 }
  0x46   :  { %700 = dma.done.wait [#allocation7], 2048  }
  0x47   :  { %701 = vsyncadd [#allocation7], 4294965248 }
  0x48   :  { %702 = dma.done.wait [#allocation10], 1024  }
  0x49   :  { %703 = vsyncadd [#allocation10], 4294966272  ;;  %v712_v0 = vmov 0.0   ;;  %vm713_vm0 = vmmov 0   ;;  %v564_v1 = vld [vmem:[#allocation6] sm:$0xff]   ;;  %v565_v2 = vld [vmem:[#allocation6 + $0x8] sm:$0xff]  }
  0x4a   :  { %495 = vmatprep.subr.bf16.mxu0 %v712_v0  ;;  %511 = vmatprep.mubr.msk.bf16.mxu0 %vm713_vm0, %v712_v0  ;;  %v566_v3 = vld [vmem:[#allocation6 + $0x10] sm:$0xff]   ;;  %v572_v4 = vld [vmem:[#allocation8] sm:$0xff]   ;;  %v567_v5 = vld [vmem:[#allocation6 + $0x18] sm:$0xff]   ;;  %s714_s30 = smov [#allocation11]  }
  0x4b   :  { %515 = vmatprep.subr.bf16.mxu1 %v712_v0  ;;  %531 = vmatprep.mubr.msk.bf16.mxu1 %vm713_vm0, %v712_v0  ;;  %v573_v6 = vld [vmem:[#allocation8 + $0x8] sm:$0xff]   ;;  %v568_v7 = vld [vmem:[#allocation6 + $0x20] sm:$0xff]   ;;  %v574_v8 = vld [vmem:[#allocation8 + $0x10] sm:$0xff]   ;;  %s430_s9 = sshll.u32 %s714_s30, 4  ;;  %s431_s9 = int_to_ptr.vmem [resolvable:$true] %s430_s9 }
  0x4c   :  { %496 = vmatpush3.bf16.msra.mxu0 %v564_v1  ;;  %516 = vmatpush3.bf16.msra.mxu1 %v572_v4  ;;  %v569_v9 = vld [vmem:[#allocation6 + $0x28] sm:$0xff]   ;;  %v575_v10 = vld [vmem:[#allocation8 + $0x18] sm:$0xff]   ;;  %v570_v11 = vld [vmem:[#allocation6 + $0x30] sm:$0xff]   ;;  %p681_p5 = scmp.lt.s32.totalorder %s431_s9, %s431_s9 }
  0x4d   :  { %497 = vmatprep.subr.bf16.mxu0 %v712_v0  ;;  %517 = vmatprep.subr.bf16.mxu1 %v712_v0  ;;  %v576_v12 = vld [vmem:[#allocation8 + $0x20] sm:$0xff]   ;;  %v571_v13 = vld [vmem:[#allocation6 + $0x38] sm:$0xff]   ;;  %v577_v14 = vld [vmem:[#allocation8 + $0x28] sm:$0xff]  }
  0x4e   :  { %v85_v15 = vld [vmem:[#allocation3] sm:$0xf]  ;;  %v578_v16 = vld [vmem:[#allocation8 + $0x30] sm:$0xff]   ;;  %v580_v18 = vld [vmem:[#allocation9] sm:$0xff]  }
  0x4f   :  { %v579_v17 = vld [vmem:[#allocation8 + $0x38] sm:$0xff]   ;;  %v581_v19 = vld [vmem:[#allocation9 + $0x8] sm:$0xff]   ;;  %v582_v20 = vld [vmem:[#allocation9 + $0x10] sm:$0xff]  }
  0x50   :  { %498 = vmatpush3.bf16.msra.mxu0 %v565_v2  ;;  %518 = vmatpush3.bf16.msra.mxu1 %v573_v6  ;;  %v583_v21 = vld [vmem:[#allocation9 + $0x18] sm:$0xff]   ;;  %v584_v22 = vld [vmem:[#allocation9 + $0x20] sm:$0xff]   ;;  %v585_v23 = vld [vmem:[#allocation9 + $0x28] sm:$0xff]  }
  0x51   :  { %499 = vmatprep.subr.bf16.mxu0 %v712_v0  ;;  %519 = vmatprep.subr.bf16.mxu1 %v712_v0  ;;  %v441_v24 = vld [vmem:[%s871_s3] ss:$0 sm:$0xff]  ;;  %v586_v32 = vld [vmem:[#allocation9 + $0x30] sm:$0xff]  }
  0x52   :  { %v587_v33 = vld [vmem:[#allocation9 + $0x38] sm:$0xff]  }
  0x53   :  { %v450_v34 = vld [vmem:[%s873_s5] ss:$0 sm:$0xff]  ;;  %s676_s5 = scalar_lea.vmem %s431_s9, 128 }
  0x54   :  { %500 = vmatpush3.bf16.msra.mxu0 %v566_v3  ;;  %520 = vmatpush3.bf16.msra.mxu1 %v574_v8  ;;  %v459_v42 = vld [vmem:[%s875_s7] ss:$0 sm:$0xff]  ;;  %p677_p4 = scmp.ne.s32.totalorder %s431_s9, %s676_s5  ;;  %p682_p6 = scmp.lt.s32.totalorder %s676_s5, %s676_s5 }
  0x55   :  { %501 = vmatprep.subr.bf16.mxu0 %v712_v0  ;;  %521 = vmatprep.subr.bf16.mxu1 %v712_v0 }
  0x56   :  { %p683_p7 = por %p682_p6, %p681_p5 }
  0x58   :  { %502 = vmatpush3.bf16.msra.mxu0 %v567_v5  ;;  %522 = vmatpush3.bf16.msra.mxu1 %v575_v10  ;;  %p684_p8 = pnand %p683_p7, %p677_p4 }
  0x59   :  { %503 = vmatprep.subr.bf16.mxu0 %v712_v0  ;;  %523 = vmatprep.subr.bf16.mxu1 %v712_v0 }
  0x5c   :  { %504 = vmatpush3.bf16.msra.mxu0 %v568_v7  ;;  %524 = vmatpush3.bf16.msra.mxu1 %v576_v12 }
  0x5d   :  { %505 = vmatprep.subr.bf16.mxu0 %v712_v0  ;;  %525 = vmatprep.subr.bf16.mxu1 %v712_v0 }
  0x60   :  { %506 = vmatpush3.bf16.msra.mxu0 %v569_v9  ;;  %526 = vmatpush3.bf16.msra.mxu1 %v577_v14 }
  0x61   :  { %507 = vmatprep.subr.bf16.mxu0 %v712_v0  ;;  %527 = vmatprep.subr.bf16.mxu1 %v712_v0 }
  0x64   :  { %508 = vmatpush3.bf16.msra.mxu0 %v570_v11  ;;  %528 = vmatpush3.bf16.msra.mxu1 %v578_v16 }
  0x65   :  { %509 = vmatprep.subr.bf16.mxu0 %v712_v0  ;;  %529 = vmatprep.subr.bf16.mxu1 %v712_v0 }
  0x68   :  { %510 = vmatpush3.bf16.msra.mxu0 %v571_v13  ;;  %530 = vmatpush3.bf16.msra.mxu1 %v579_v17 }
  0x69   :  { %535 = vmatprep.subr.bf16.mxu0 %v712_v0 }
  0x6b   :  { %512 = vmatmul.mubr.bf16.vlgmr.msra.gmra.mrb[0].mxu0 %v85_v15 }
  0x6c   :  { %551 = vmatprep.mubr.msk.bf16.mxu0 %vm713_vm0, %v712_v0  ;;  %536 = vmatpush3.bf16.msra.mxu0 %v580_v18 }
  0x6d   :  { %537 = vmatprep.subr.bf16.mxu0 %v712_v0 }
  0x70   :  { %538 = vmatpush3.bf16.msra.mxu0 %v581_v19 }
  0x71   :  { %539 = vmatprep.subr.bf16.mxu0 %v712_v0 }
  0x74   :  { %540 = vmatpush3.bf16.msra.mxu0 %v582_v20 }
  0x75   :  { %541 = vmatprep.subr.bf16.mxu0 %v712_v0 }
  0x78   :  { %542 = vmatpush3.bf16.msra.mxu0 %v583_v21 }
  0x79   :  { %543 = vmatprep.subr.bf16.mxu0 %v712_v0 }
  0x7c   :  { %544 = vmatpush3.bf16.msra.mxu0 %v584_v22 }
  0x7d   :  { %545 = vmatprep.subr.bf16.mxu0 %v712_v0 }
  0x80   :  { %546 = vmatpush3.bf16.msra.mxu0 %v585_v23 }
  0x81   :  { %547 = vmatprep.subr.bf16.mxu0 %v712_v0 }
  0x84   :  { %548 = vmatpush3.bf16.msra.mxu0 %v586_v32 }
  0x85   :  { %549 = vmatprep.subr.bf16.mxu0 %v712_v0 }
  0x88   :  { %550 = vmatpush3.bf16.msra.mxu0 %v587_v33 }
 0x13e   :  { %v191_v25 = vpop.f32.mrb[0].mxu0 }
 0x13f   :  { %v192_v26 = vadd.f32 %v441_v24, %v191_v25  ;;  %v513_v27 = vpop.f32.mrb[1].mxu0 }
 0x140   :  { %v194_v28 = vpop.f32.mrb[2].mxu0 }
 0x141   :  { %v197_v29 = vmax.f32 %v192_v26, 0.0  ;;  %v514_v30 = vpop.f32.mrb[3].mxu0 }
 0x143   :  { %v198_v31 = vpack.c.bf16 %v197_v29, %v197_v29 }
 0x145   :  { %532 = vmatmul.mubr.bf16.vlgmr.msra.gmra.mrb[0].mxu1 %v198_v31 }
 0x218   :  { %v304_v35 = vpop.f32.mrb[0].mxu1 }
 0x219   :  { %v305_v36 = vadd.f32 %v450_v34, %v304_v35  ;;  %v533_v37 = vpop.f32.mrb[1].mxu1 }
 0x21a   :  { %v307_v38 = vpop.f32.mrb[2].mxu1 }
 0x21b   :  { %v310_v39 = vmax.f32 %v305_v36, 0.0  ;;  %v534_v40 = vpop.f32.mrb[3].mxu1 }
 0x21d   :  { %v311_v41 = vpack.c.bf16 %v310_v39, %v310_v39 }
 0x21f   :  { %552 = vmatmul.mubr.bf16.vlgmr.msra.gmra.mrb[4].mxu0 %v311_v41 }
 0x2f2   :  { %v417_v43 = vpop.f32.mrb[4].mxu0 }
 0x2f3   :  { %v418_v44 = vadd.f32 %v459_v42, %v417_v43  ;;  %v553_v45 = vpop.f32.mrb[5].mxu0 }
 0x2f4   :  { %v420_v46 = vpop.f32.mrb[6].mxu0 }
 0x2f5   :  { %423 = vst [vmem:[#allocation11] sm:$0xff] %v418_v44  ;;  %v554_v47 = vpop.f32.mrb[7].mxu0 }
 0x2f6   :  { %687 = shalt.err (!%p684_p8)
}
 0x2f7   :  { %s688_s7 = scalar_lea.hbm %s876_s8, 128 }
 0x2f8   :  { %p689_p9 = scmp.ne.s32.totalorder %s876_s8, %s688_s7  ;;  %p692_p10 = scmp.lt.u32.totalorder %s688_s7, %s876_s8 }
 0x2fa   :  { %p694_p11 = pnand %p692_p10, %p689_p9 }
 0x2fc   :  { %697 = shalt.err (!%p694_p11)
}
 0x2fd   :  { %433 = dma.vmem_to_hbm [thread:$0]  %s431_s9, 128, %s876_s8, [#allocation5]  }
 0x2fe   :  { %704 = dma.done.wait [#allocation5], 128  }
 0x2ff   :  { %705 = vsyncadd [#allocation5], 4294967168 }
 0x300   :  { %437 = vsyncpa [#allocation4], 1 }
 0x301   :  { %438 = vsyncpa [#allocation7], 1 }
 0x302   :  { %439 = vsyncpa [#allocation10], 1 }
 0x303   :  { %440 = vsyncpa [#allocation5], 1 }

// kernel: tpu_custom_call.1
= control target key start
LH: loop header
LB: loop body
LE: loop exit
PB: predicated region body
PF: predicated region fallthrough
CT: control target
= control target key end

     0   :  { %14 = vsyncpa [#allocation3], 0  ;;  %s987_s0 = inlined_call_operand.hbm [shape: bf16[8,128], index: 0, kind: input, shape index: {}]   ;;  %s988_s1 = inlined_call_operand.hbm [shape: s32[8,128], index: 1, kind: input, shape index: {}]   ;;  %s989_s2 = inlined_call_operand.hbm [shape: s32[8,128], index: 2, kind: input, shape index: {}]   ;;  %s990_s3 = inlined_call_operand.hbm [shape: bf16[128,128], index: 3, kind: input, shape index: {}]   ;;  %s991_s4 = inlined_call_operand.vmem [shape: f32[1,128], index: 4, kind: input, shape index: {}]   ;;  %s992_s5 = inlined_call_operand.hbm [shape: bf16[128,128], index: 5, kind: input, shape index: {}]   ;;  %s993_s6 = inlined_call_operand.vmem [shape: f32[1,128], index: 6, kind: input, shape index: {}]   ;;  %s994_s7 = inlined_call_operand.hbm [shape: bf16[128,128], index: 7, kind: input, shape index: {}]   ;;  %s995_s8 = inlined_call_operand.vmem [shape: f32[1,128], index: 8, kind: input, shape index: {}]   ;;  %s996_s9 = inlined_call_operand.hbm [shape: f32[8,128], index: 9, kind: output, shape index: {}]  }
   0x1   :  { %15 = vsyncpa [#allocation6], 0 }
   0x2   :  { %16 = vsyncpa [#allocation9], 0 }
   0x3   :  { %17 = vsyncpa [#allocation12], 0 }
   0x4   :  { %18 = vsyncpa [#allocation4], 0  ;;  %s780_s30 = smov [#allocation5]   ;;  %s781_s11 = smov [#allocation8]  }
   0x5   :  { %s35_s10 = sshll.u32 %s780_s30, 4  ;;  %s54_s12 = sshll.u32 %s781_s11, 4  ;;  %s36_s10 = int_to_ptr.vmem [resolvable:$true] %s35_s10  ;;  %s841_s12 = int_to_ptr.vmem [resolvable:$true] %s54_s12 }
   0x6   :  { %s616_s15 = scalar_lea.hbm %s988_s1, 128 }
   0x7   :  { %p617_p0 = scmp.ne.s32.totalorder %s988_s1, %s616_s15  ;;  %p620_p1 = scmp.lt.u32.totalorder %s616_s15, %s988_s1 }
   0x9   :  { %p622_p2 = pnand %p620_p1, %p617_p0 }
   0xb   :  { %625 = shalt.err (!%p622_p2)
}
   0xc   :  { %s626_s20 = scalar_lea.vmem %s36_s10, 128  ;;  %p631_p4 = scmp.lt.s32.totalorder %s36_s10, %s36_s10 }
   0xd   :  { %p627_p3 = scmp.ne.s32.totalorder %s36_s10, %s626_s20  ;;  %p632_p5 = scmp.lt.s32.totalorder %s626_s20, %s626_s20 }
   0xf   :  { %p633_p6 = por %p632_p5, %p631_p4 }
  0x11   :  { %p634_p7 = pnand %p633_p6, %p627_p3 }
  0x13   :  { %637 = shalt.err (!%p634_p7)
}
  0x14   :  { %38 = dma.hbm_to_vmem [thread:$0]  %s988_s1, 128, %s36_s10, [#allocation6]  }
  0x15   :  { %s638_s25 = scalar_lea.hbm %s990_s3, 1024 }
  0x16   :  { %p639_p8 = scmp.ne.s32.totalorder %s990_s3, %s638_s25  ;;  %p642_p9 = scmp.lt.u32.totalorder %s638_s25, %s990_s3 }
  0x18   :  { %p644_p10 = pnand %p642_p9, %p639_p8 }
  0x1a   :  { %647 = shalt.err (!%p644_p10)
}
  0x1b   :  { %s648_s30 = scalar_lea.vmem %s841_s12, 1024  ;;  %p653_p12 = scmp.lt.s32.totalorder %s841_s12, %s841_s12 }
  0x1c   :  { %p649_p11 = scmp.ne.s32.totalorder %s841_s12, %s648_s30  ;;  %p654_p13 = scmp.lt.s32.totalorder %s648_s30, %s648_s30 }
  0x1e   :  { %p655_p0 = por %p654_p13, %p653_p12 }
  0x20   :  { %p656_p1 = pnand %p655_p0, %p649_p11 }
  0x22   :  { %659 = shalt.err (!%p656_p1)
}
  0x23   :  { %s782_s1 = smov 64   ;;  %s783_s10 = smov 4  }
  0x24   :  { %60 = dma.hbm_to_vmem [thread:$0]  %s990_s3, 1024, %s841_s12, [#allocation9], %s782_s1, %s782_s1, %s783_s10  }
  0x25   :  { %s784_s14 = smov [#allocation2]   ;;  %s785_s16 = smov [#allocation7]  }
  0x26   :  { %s25_s15 = sshll.u32 %s784_s14, 4  ;;  %s45_s17 = sshll.u32 %s785_s16, 4  ;;  %s26_s15 = int_to_ptr.vmem [resolvable:$true] %s25_s15  ;;  %s46_s17 = int_to_ptr.vmem [resolvable:$true] %s45_s17 }
  0x27   :  { %s660_s20 = scalar_lea.hbm %s987_s0, 64 }
  0x28   :  { %p661_p2 = scmp.ne.s32.totalorder %s987_s0, %s660_s20  ;;  %p664_p3 = scmp.lt.u32.totalorder %s660_s20, %s987_s0 }
  0x2a   :  { %p666_p4 = pnand %p664_p3, %p661_p2 }
  0x2c   :  { %669 = shalt.err (!%p666_p4)
}
  0x2d   :  { %s670_s3 = scalar_lea.vmem %s26_s15, 64  ;;  %p675_p6 = scmp.lt.s32.totalorder %s26_s15, %s26_s15 }
  0x2e   :  { %p671_p5 = scmp.ne.s32.totalorder %s26_s15, %s670_s3  ;;  %p676_p7 = scmp.lt.s32.totalorder %s670_s3, %s670_s3 }
  0x30   :  { %p677_p8 = por %p676_p7, %p675_p6 }
  0x32   :  { %p678_p9 = pnand %p677_p8, %p671_p5 }
  0x34   :  { %681 = shalt.err (!%p678_p9)
}
  0x35   :  { %28 = dma.hbm_to_vmem [thread:$0]  %s987_s0, 64, %s26_s15, [#allocation3]  }
  0x36   :  { %s682_s28 = scalar_lea.hbm %s989_s2, 128 }
  0x37   :  { %p683_p10 = scmp.ne.s32.totalorder %s989_s2, %s682_s28  ;;  %p686_p11 = scmp.lt.u32.totalorder %s682_s28, %s989_s2 }
  0x39   :  { %p688_p12 = pnand %p686_p11, %p683_p10 }
  0x3b   :  { %691 = shalt.err (!%p688_p12)
}
  0x3c   :  { %s692_s14 = scalar_lea.vmem %s46_s17, 128  ;;  %p697_p0 = scmp.lt.s32.totalorder %s46_s17, %s46_s17 }
  0x3d   :  { %p693_p13 = scmp.ne.s32.totalorder %s46_s17, %s692_s14  ;;  %p698_p1 = scmp.lt.s32.totalorder %s692_s14, %s692_s14 }
  0x3f   :  { %p699_p2 = por %p698_p1, %p697_p0 }
  0x41   :  { %p700_p3 = pnand %p699_p2, %p693_p13 }
  0x43   :  { %703 = shalt.err (!%p700_p3)
}
  0x44   :  { %48 = dma.hbm_to_vmem [thread:$0]  %s989_s2, 128, %s46_s17, [#allocation6]  }
  0x45   :  { %s786_s16 = smov [#allocation10]   ;;  %s787_s19 = smov [#allocation11]  }
  0x46   :  { %s68_s18 = sshll.u32 %s786_s16, 4  ;;  %s82_s20 = sshll.u32 %s787_s19, 4  ;;  %s69_s18 = int_to_ptr.vmem [resolvable:$true] %s68_s18  ;;  %s899_s20 = int_to_ptr.vmem [resolvable:$true] %s82_s20 }
  0x47   :  { %s704_s23 = scalar_lea.hbm %s992_s5, 1024 }
  0x48   :  { %p705_p4 = scmp.ne.s32.totalorder %s992_s5, %s704_s23  ;;  %p708_p5 = scmp.lt.u32.totalorder %s704_s23, %s992_s5 }
  0x4a   :  { %p710_p6 = pnand %p708_p5, %p705_p4 }
  0x4c   :  { %713 = shalt.err (!%p710_p6)
}
  0x4d   :  { %s714_s2 = scalar_lea.vmem %s69_s18, 1024  ;;  %p719_p8 = scmp.lt.s32.totalorder %s69_s18, %s69_s18 }
  0x4e   :  { %p715_p7 = scmp.ne.s32.totalorder %s69_s18, %s714_s2  ;;  %p720_p9 = scmp.lt.s32.totalorder %s714_s2, %s714_s2 }
  0x50   :  { %p721_p10 = por %p720_p9, %p719_p8 }
  0x52   :  { %p722_p11 = pnand %p721_p10, %p715_p7 }
  0x54   :  { %725 = shalt.err (!%p722_p11)
}
  0x55   :  { %74 = dma.hbm_to_vmem [thread:$0]  %s992_s5, 1024, %s69_s18, [#allocation9], %s782_s1, %s782_s1, %s783_s10  }
  0x56   :  { %s726_s29 = scalar_lea.hbm %s994_s7, 1024 }
  0x57   :  { %p727_p12 = scmp.ne.s32.totalorder %s994_s7, %s726_s29  ;;  %p730_p13 = scmp.lt.u32.totalorder %s726_s29, %s994_s7 }
  0x59   :  { %p732_p0 = pnand %p730_p13, %p727_p12 }
  0x5b   :  { %735 = shalt.err (!%p732_p0)
}
  0x5c   :  { %s736_s0 = scalar_lea.vmem %s899_s20, 1024  ;;  %p741_p2 = scmp.lt.s32.totalorder %s899_s20, %s899_s20 }
  0x5d   :  { %p737_p1 = scmp.ne.s32.totalorder %s899_s20, %s736_s0  ;;  %p742_p3 = scmp.lt.s32.totalorder %s736_s0, %s736_s0 }
  0x5f   :  { %p743_p4 = por %p742_p3, %p741_p2 }
  0x61   :  { %p744_p5 = pnand %p743_p4, %p737_p1 }
  0x63   :  { %747 = shalt.err (!%p744_p5)
}
  0x64   :  { %88 = dma.hbm_to_vmem [thread:$0]  %s994_s7, 1024, %s899_s20, [#allocation12], %s782_s1, %s782_s1, %s783_s10  }
  0x65   :  { %770 = dma.done.wait [#allocation3], 64  }
  0x66   :  { %771 = vsyncadd [#allocation3], 4294967232 }
  0x67   :  { %772 = dma.done.wait [#allocation6], 256  }
  0x68   :  { %773 = vsyncadd [#allocation6], 4294967040 }
  0x69   :  { %774 = dma.done.wait [#allocation9], 2048  }
  0x6a   :  { %775 = vsyncadd [#allocation9], 4294965248 }
  0x6b   :  { %776 = dma.done.wait [#allocation12], 1024  }
  0x6c   :  { %777 = vsyncadd [#allocation12], 4294966272  ;;  %v788_v0 = vmov 0.0   ;;  %vm789_vm0 = vmmov 0   ;;  %v592_v1 = vld [vmem:[#allocation8] sm:$0xff]   ;;  %v593_v2 = vld [vmem:[#allocation8 + $0x8] sm:$0xff]  }
  0x6d   :  { %521 = vmatprep.subr.bf16.mxu0 %v788_v0  ;;  %537 = vmatprep.mubr.msk.bf16.mxu0 %vm789_vm0, %v788_v0  ;;  %v594_v3 = vld [vmem:[#allocation8 + $0x10] sm:$0xff]   ;;  %v600_v4 = vld [vmem:[#allocation10] sm:$0xff]   ;;  %v595_v5 = vld [vmem:[#allocation8 + $0x18] sm:$0xff]   ;;  %s790_s19 = smov [#allocation13]  }
  0x6e   :  { %541 = vmatprep.subr.bf16.mxu1 %v788_v0  ;;  %557 = vmatprep.mubr.msk.bf16.mxu1 %vm789_vm0, %v788_v0  ;;  %v601_v6 = vld [vmem:[#allocation10 + $0x8] sm:$0xff]   ;;  %v596_v7 = vld [vmem:[#allocation8 + $0x20] sm:$0xff]   ;;  %v602_v8 = vld [vmem:[#allocation10 + $0x10] sm:$0xff]   ;;  %s455_s20 = sshll.u32 %s790_s19, 4  ;;  %s456_s20 = int_to_ptr.vmem [resolvable:$true] %s455_s20 }
  0x6f   :  { %522 = vmatpush3.bf16.msra.mxu0 %v592_v1  ;;  %542 = vmatpush3.bf16.msra.mxu1 %v600_v4  ;;  %v597_v9 = vld [vmem:[#allocation8 + $0x28] sm:$0xff]   ;;  %v603_v10 = vld [vmem:[#allocation10 + $0x18] sm:$0xff]   ;;  %v598_v11 = vld [vmem:[#allocation8 + $0x30] sm:$0xff]   ;;  %p753_p7 = scmp.lt.s32.totalorder %s456_s20, %s456_s20 }
  0x70   :  { %523 = vmatprep.subr.bf16.mxu0 %v788_v0  ;;  %543 = vmatprep.subr.bf16.mxu1 %v788_v0  ;;  %v604_v12 = vld [vmem:[#allocation10 + $0x20] sm:$0xff]   ;;  %v599_v13 = vld [vmem:[#allocation8 + $0x38] sm:$0xff]   ;;  %v605_v14 = vld [vmem:[#allocation10 + $0x28] sm:$0xff]  }
  0x71   :  { %v110_v15 = vld [vmem:[#allocation2] sm:$0xf]  ;;  %v606_v16 = vld [vmem:[#allocation10 + $0x30] sm:$0xff]   ;;  %v607_v17 = vld [vmem:[#allocation10 + $0x38] sm:$0xff]  }
  0x72   :  { %v608_v18 = vld [vmem:[#allocation11] sm:$0xff]   ;;  %v609_v19 = vld [vmem:[#allocation11 + $0x8] sm:$0xff]   ;;  %v610_v20 = vld [vmem:[#allocation11 + $0x10] sm:$0xff]  }
  0x73   :  { %524 = vmatpush3.bf16.msra.mxu0 %v593_v2  ;;  %544 = vmatpush3.bf16.msra.mxu1 %v601_v6  ;;  %v611_v21 = vld [vmem:[#allocation11 + $0x18] sm:$0xff]   ;;  %v612_v22 = vld [vmem:[#allocation11 + $0x20] sm:$0xff]   ;;  %v613_v23 = vld [vmem:[#allocation11 + $0x28] sm:$0xff]  }
  0x74   :  { %525 = vmatprep.subr.bf16.mxu0 %v788_v0  ;;  %545 = vmatprep.subr.bf16.mxu1 %v788_v0  ;;  %v467_v24 = vld [vmem:[%s991_s4] ss:$0 sm:$0xff]  ;;  %v614_v32 = vld [vmem:[#allocation11 + $0x30] sm:$0xff]   ;;  %v615_v33 = vld [vmem:[#allocation11 + $0x38] sm:$0xff]  }
  0x75   :  { %v476_v34 = vld [vmem:[%s993_s6] ss:$0 sm:$0xff]  ;;  %s748_s6 = scalar_lea.vmem %s456_s20, 128 }
  0x76   :  { %v485_v42 = vld [vmem:[%s995_s8] ss:$0 sm:$0xff]  ;;  %p749_p6 = scmp.ne.s32.totalorder %s456_s20, %s748_s6  ;;  %p754_p8 = scmp.lt.s32.totalorder %s748_s6, %s748_s6 }
  0x77   :  { %526 = vmatpush3.bf16.msra.mxu0 %v594_v3  ;;  %546 = vmatpush3.bf16.msra.mxu1 %v602_v8 }
  0x78   :  { %527 = vmatprep.subr.bf16.mxu0 %v788_v0  ;;  %547 = vmatprep.subr.bf16.mxu1 %v788_v0  ;;  %p755_p9 = por %p754_p8, %p753_p7 }
  0x7a   :  { %p756_p10 = pnand %p755_p9, %p749_p6 }
  0x7b   :  { %528 = vmatpush3.bf16.msra.mxu0 %v595_v5  ;;  %548 = vmatpush3.bf16.msra.mxu1 %v603_v10 }
  0x7c   :  { %529 = vmatprep.subr.bf16.mxu0 %v788_v0  ;;  %549 = vmatprep.subr.bf16.mxu1 %v788_v0 }
  0x7f   :  { %530 = vmatpush3.bf16.msra.mxu0 %v596_v7  ;;  %550 = vmatpush3.bf16.msra.mxu1 %v604_v12 }
  0x80   :  { %531 = vmatprep.subr.bf16.mxu0 %v788_v0  ;;  %551 = vmatprep.subr.bf16.mxu1 %v788_v0 }
  0x83   :  { %532 = vmatpush3.bf16.msra.mxu0 %v597_v9  ;;  %552 = vmatpush3.bf16.msra.mxu1 %v605_v14 }
  0x84   :  { %533 = vmatprep.subr.bf16.mxu0 %v788_v0  ;;  %553 = vmatprep.subr.bf16.mxu1 %v788_v0 }
  0x87   :  { %534 = vmatpush3.bf16.msra.mxu0 %v598_v11  ;;  %554 = vmatpush3.bf16.msra.mxu1 %v606_v16 }
  0x88   :  { %535 = vmatprep.subr.bf16.mxu0 %v788_v0  ;;  %555 = vmatprep.subr.bf16.mxu1 %v788_v0 }
  0x8b   :  { %536 = vmatpush3.bf16.msra.mxu0 %v599_v13  ;;  %556 = vmatpush3.bf16.msra.mxu1 %v607_v17 }
  0x8c   :  { %561 = vmatprep.subr.bf16.mxu0 %v788_v0 }
  0x8e   :  { %538 = vmatmul.mubr.bf16.vlgmr.msra.gmra.mrb[0].mxu0 %v110_v15 }
  0x8f   :  { %577 = vmatprep.mubr.msk.bf16.mxu0 %vm789_vm0, %v788_v0  ;;  %562 = vmatpush3.bf16.msra.mxu0 %v608_v18 }
  0x90   :  { %563 = vmatprep.subr.bf16.mxu0 %v788_v0 }
  0x93   :  { %564 = vmatpush3.bf16.msra.mxu0 %v609_v19 }
  0x94   :  { %565 = vmatprep.subr.bf16.mxu0 %v788_v0 }
  0x97   :  { %566 = vmatpush3.bf16.msra.mxu0 %v610_v20 }
  0x98   :  { %567 = vmatprep.subr.bf16.mxu0 %v788_v0 }
  0x9b   :  { %568 = vmatpush3.bf16.msra.mxu0 %v611_v21 }
  0x9c   :  { %569 = vmatprep.subr.bf16.mxu0 %v788_v0 }
  0x9f   :  { %570 = vmatpush3.bf16.msra.mxu0 %v612_v22 }
  0xa0   :  { %571 = vmatprep.subr.bf16.mxu0 %v788_v0 }
  0xa3   :  { %572 = vmatpush3.bf16.msra.mxu0 %v613_v23 }
  0xa4   :  { %573 = vmatprep.subr.bf16.mxu0 %v788_v0 }
  0xa7   :  { %574 = vmatpush3.bf16.msra.mxu0 %v614_v32 }
  0xa8   :  { %575 = vmatprep.subr.bf16.mxu0 %v788_v0 }
  0xab   :  { %576 = vmatpush3.bf16.msra.mxu0 %v615_v33 }
 0x161   :  { %v216_v25 = vpop.f32.mrb[0].mxu0 }
 0x162   :  { %v217_v26 = vadd.f32 %v467_v24, %v216_v25  ;;  %v539_v27 = vpop.f32.mrb[1].mxu0 }
 0x163   :  { %v219_v28 = vpop.f32.mrb[2].mxu0 }
 0x164   :  { %v222_v29 = vmax.f32 %v217_v26, 0.0  ;;  %v540_v30 = vpop.f32.mrb[3].mxu0 }
 0x166   :  { %v223_v31 = vpack.c.bf16 %v222_v29, %v222_v29 }
 0x168   :  { %558 = vmatmul.mubr.bf16.vlgmr.msra.gmra.mrb[0].mxu1 %v223_v31 }
 0x23b   :  { %v329_v35 = vpop.f32.mrb[0].mxu1 }
 0x23c   :  { %v330_v36 = vadd.f32 %v476_v34, %v329_v35  ;;  %v559_v37 = vpop.f32.mrb[1].mxu1 }
 0x23d   :  { %v332_v38 = vpop.f32.mrb[2].mxu1 }
 0x23e   :  { %v335_v39 = vmax.f32 %v330_v36, 0.0  ;;  %v560_v40 = vpop.f32.mrb[3].mxu1 }
 0x240   :  { %v336_v41 = vpack.c.bf16 %v335_v39, %v335_v39 }
 0x242   :  { %578 = vmatmul.mubr.bf16.vlgmr.msra.gmra.mrb[4].mxu0 %v336_v41 }
 0x315   :  { %v442_v43 = vpop.f32.mrb[4].mxu0 }
 0x316   :  { %v443_v44 = vadd.f32 %v485_v42, %v442_v43  ;;  %v579_v45 = vpop.f32.mrb[5].mxu0 }
 0x317   :  { %v445_v46 = vpop.f32.mrb[6].mxu0 }
 0x318   :  { %448 = vst [vmem:[#allocation13] sm:$0xff] %v443_v44  ;;  %v580_v47 = vpop.f32.mrb[7].mxu0 }
 0x319   :  { %759 = shalt.err (!%p756_p10)
}
 0x31a   :  { %s760_s8 = scalar_lea.hbm %s996_s9, 128 }
 0x31b   :  { %p761_p11 = scmp.ne.s32.totalorder %s996_s9, %s760_s8  ;;  %p764_p12 = scmp.lt.u32.totalorder %s760_s8, %s996_s9 }
 0x31d   :  { %p766_p13 = pnand %p764_p12, %p761_p11 }
 0x31f   :  { %769 = shalt.err (!%p766_p13)
}
 0x320   :  { %458 = dma.vmem_to_hbm [thread:$0]  %s456_s20, 128, %s996_s9, [#allocation4]  }
 0x321   :  { %778 = dma.done.wait [#allocation4], 128  }
 0x322   :  { %779 = vsyncadd [#allocation4], 4294967168 }
 0x323   :  { %462 = vsyncpa [#allocation3], 1 }
 0x324   :  { %463 = vsyncpa [#allocation6], 1 }
 0x325   :  { %464 = vsyncpa [#allocation9], 1 }
 0x326   :  { %465 = vsyncpa [#allocation12], 1 }
 0x327   :  { %466 = vsyncpa [#allocation4], 1 }

// kernel: tpu_custom_call.1
= control target key start
LH: loop header
LB: loop body
LE: loop exit
PB: predicated region body
PF: predicated region fallthrough
CT: control target
= control target key end

     0   :  { %14 = vsyncpa [#allocation3], 0  ;;  %s987_s0 = inlined_call_operand.hbm [shape: bf16[8,128], index: 0, kind: input, shape index: {}]   ;;  %s988_s1 = inlined_call_operand.hbm [shape: s32[8,128], index: 1, kind: input, shape index: {}]   ;;  %s989_s2 = inlined_call_operand.hbm [shape: s32[8,128], index: 2, kind: input, shape index: {}]   ;;  %s990_s3 = inlined_call_operand.hbm [shape: bf16[128,128], index: 3, kind: input, shape index: {}]   ;;  %s991_s4 = inlined_call_operand.vmem [shape: f32[1,128], index: 4, kind: input, shape index: {}]   ;;  %s992_s5 = inlined_call_operand.hbm [shape: bf16[128,128], index: 5, kind: input, shape index: {}]   ;;  %s993_s6 = inlined_call_operand.vmem [shape: f32[1,128], index: 6, kind: input, shape index: {}]   ;;  %s994_s7 = inlined_call_operand.hbm [shape: bf16[128,128], index: 7, kind: input, shape index: {}]   ;;  %s995_s8 = inlined_call_operand.vmem [shape: f32[1,128], index: 8, kind: input, shape index: {}]   ;;  %s996_s9 = inlined_call_operand.hbm [shape: f32[8,128], index: 9, kind: output, shape index: {}]  }
   0x1   :  { %15 = vsyncpa [#allocation6], 0 }
   0x2   :  { %16 = vsyncpa [#allocation9], 0 }
   0x3   :  { %17 = vsyncpa [#allocation12], 0 }
   0x4   :  { %18 = vsyncpa [#allocation4], 0  ;;  %s780_s30 = smov [#allocation5]   ;;  %s781_s11 = smov [#allocation8]  }
   0x5   :  { %s35_s10 = sshll.u32 %s780_s30, 4  ;;  %s54_s12 = sshll.u32 %s781_s11, 4  ;;  %s36_s10 = int_to_ptr.vmem [resolvable:$true] %s35_s10  ;;  %s841_s12 = int_to_ptr.vmem [resolvable:$true] %s54_s12 }
   0x6   :  { %s616_s15 = scalar_lea.hbm %s988_s1, 128 }
   0x7   :  { %p617_p0 = scmp.ne.s32.totalorder %s988_s1, %s616_s15  ;;  %p620_p1 = scmp.lt.u32.totalorder %s616_s15, %s988_s1 }
   0x9   :  { %p622_p2 = pnand %p620_p1, %p617_p0 }
   0xb   :  { %625 = shalt.err (!%p622_p2)
}
   0xc   :  { %s626_s20 = scalar_lea.vmem %s36_s10, 128  ;;  %p631_p4 = scmp.lt.s32.totalorder %s36_s10, %s36_s10 }
   0xd   :  { %p627_p3 = scmp.ne.s32.totalorder %s36_s10, %s626_s20  ;;  %p632_p5 = scmp.lt.s32.totalorder %s626_s20, %s626_s20 }
   0xf   :  { %p633_p6 = por %p632_p5, %p631_p4 }
  0x11   :  { %p634_p7 = pnand %p633_p6, %p627_p3 }
  0x13   :  { %637 = shalt.err (!%p634_p7)
}
  0x14   :  { %38 = dma.hbm_to_vmem [thread:$0]  %s988_s1, 128, %s36_s10, [#allocation6]  }
  0x15   :  { %s638_s25 = scalar_lea.hbm %s990_s3, 1024 }
  0x16   :  { %p639_p8 = scmp.ne.s32.totalorder %s990_s3, %s638_s25  ;;  %p642_p9 = scmp.lt.u32.totalorder %s638_s25, %s990_s3 }
  0x18   :  { %p644_p10 = pnand %p642_p9, %p639_p8 }
  0x1a   :  { %647 = shalt.err (!%p644_p10)
}
  0x1b   :  { %s648_s30 = scalar_lea.vmem %s841_s12, 1024  ;;  %p653_p12 = scmp.lt.s32.totalorder %s841_s12, %s841_s12 }
  0x1c   :  { %p649_p11 = scmp.ne.s32.totalorder %s841_s12, %s648_s30  ;;  %p654_p13 = scmp.lt.s32.totalorder %s648_s30, %s648_s30 }
  0x1e   :  { %p655_p0 = por %p654_p13, %p653_p12 }
  0x20   :  { %p656_p1 = pnand %p655_p0, %p649_p11 }
  0x22   :  { %659 = shalt.err (!%p656_p1)
}
  0x23   :  { %s782_s1 = smov 64   ;;  %s783_s10 = smov 4  }
  0x24   :  { %60 = dma.hbm_to_vmem [thread:$0]  %s990_s3, 1024, %s841_s12, [#allocation9], %s782_s1, %s782_s1, %s783_s10  }
  0x25   :  { %s784_s14 = smov [#allocation2]   ;;  %s785_s16 = smov [#allocation7]  }
  0x26   :  { %s25_s15 = sshll.u32 %s784_s14, 4  ;;  %s45_s17 = sshll.u32 %s785_s16, 4  ;;  %s26_s15 = int_to_ptr.vmem [resolvable:$true] %s25_s15  ;;  %s46_s17 = int_to_ptr.vmem [resolvable:$true] %s45_s17 }
  0x27   :  { %s660_s20 = scalar_lea.hbm %s987_s0, 64 }
  0x28   :  { %p661_p2 = scmp.ne.s32.totalorder %s987_s0, %s660_s20  ;;  %p664_p3 = scmp.lt.u32.totalorder %s660_s20, %s987_s0 }
  0x2a   :  { %p666_p4 = pnand %p664_p3, %p661_p2 }
  0x2c   :  { %669 = shalt.err (!%p666_p4)
}
  0x2d   :  { %s670_s3 = scalar_lea.vmem %s26_s15, 64  ;;  %p675_p6 = scmp.lt.s32.totalorder %s26_s15, %s26_s15 }
  0x2e   :  { %p671_p5 = scmp.ne.s32.totalorder %s26_s15, %s670_s3  ;;  %p676_p7 = scmp.lt.s32.totalorder %s670_s3, %s670_s3 }
  0x30   :  { %p677_p8 = por %p676_p7, %p675_p6 }
  0x32   :  { %p678_p9 = pnand %p677_p8, %p671_p5 }
  0x34   :  { %681 = shalt.err (!%p678_p9)
}
  0x35   :  { %28 = dma.hbm_to_vmem [thread:$0]  %s987_s0, 64, %s26_s15, [#allocation3]  }
  0x36   :  { %s682_s28 = scalar_lea.hbm %s989_s2, 128 }
  0x37   :  { %p683_p10 = scmp.ne.s32.totalorder %s989_s2, %s682_s28  ;;  %p686_p11 = scmp.lt.u32.totalorder %s682_s28, %s989_s2 }
  0x39   :  { %p688_p12 = pnand %p686_p11, %p683_p10 }
  0x3b   :  { %691 = shalt.err (!%p688_p12)
}
  0x3c   :  { %s692_s14 = scalar_lea.vmem %s46_s17, 128  ;;  %p697_p0 = scmp.lt.s32.totalorder %s46_s17, %s46_s17 }
  0x3d   :  { %p693_p13 = scmp.ne.s32.totalorder %s46_s17, %s692_s14  ;;  %p698_p1 = scmp.lt.s32.totalorder %s692_s14, %s692_s14 }
  0x3f   :  { %p699_p2 = por %p698_p1, %p697_p0 }
  0x41   :  { %p700_p3 = pnand %p699_p2, %p693_p13 }
  0x43   :  { %703 = shalt.err (!%p700_p3)
}
  0x44   :  { %48 = dma.hbm_to_vmem [thread:$0]  %s989_s2, 128, %s46_s17, [#allocation6]  }
  0x45   :  { %s786_s16 = smov [#allocation10]   ;;  %s787_s19 = smov [#allocation11]  }
  0x46   :  { %s68_s18 = sshll.u32 %s786_s16, 4  ;;  %s82_s20 = sshll.u32 %s787_s19, 4  ;;  %s69_s18 = int_to_ptr.vmem [resolvable:$true] %s68_s18  ;;  %s899_s20 = int_to_ptr.vmem [resolvable:$true] %s82_s20 }
  0x47   :  { %s704_s23 = scalar_lea.hbm %s992_s5, 1024 }
  0x48   :  { %p705_p4 = scmp.ne.s32.totalorder %s992_s5, %s704_s23  ;;  %p708_p5 = scmp.lt.u32.totalorder %s704_s23, %s992_s5 }
  0x4a   :  { %p710_p6 = pnand %p708_p5, %p705_p4 }
  0x4c   :  { %713 = shalt.err (!%p710_p6)
}
  0x4d   :  { %s714_s2 = scalar_lea.vmem %s69_s18, 1024  ;;  %p719_p8 = scmp.lt.s32.totalorder %s69_s18, %s69_s18 }
  0x4e   :  { %p715_p7 = scmp.ne.s32.totalorder %s69_s18, %s714_s2  ;;  %p720_p9 = scmp.lt.s32.totalorder %s714_s2, %s714_s2 }
  0x50   :  { %p721_p10 = por %p720_p9, %p719_p8 }
  0x52   :  { %p722_p11 = pnand %p721_p10, %p715_p7 }
  0x54   :  { %725 = shalt.err (!%p722_p11)
}
  0x55   :  { %74 = dma.hbm_to_vmem [thread:$0]  %s992_s5, 1024, %s69_s18, [#allocation9], %s782_s1, %s782_s1, %s783_s10  }
  0x56   :  { %s726_s29 = scalar_lea.hbm %s994_s7, 1024 }
  0x57   :  { %p727_p12 = scmp.ne.s32.totalorder %s994_s7, %s726_s29  ;;  %p730_p13 = scmp.lt.u32.totalorder %s726_s29, %s994_s7 }
  0x59   :  { %p732_p0 = pnand %p730_p13, %p727_p12 }
  0x5b   :  { %735 = shalt.err (!%p732_p0)
}
  0x5c   :  { %s736_s0 = scalar_lea.vmem %s899_s20, 1024  ;;  %p741_p2 = scmp.lt.s32.totalorder %s899_s20, %s899_s20 }
  0x5d   :  { %p737_p1 = scmp.ne.s32.totalorder %s899_s20, %s736_s0  ;;  %p742_p3 = scmp.lt.s32.totalorder %s736_s0, %s736_s0 }
  0x5f   :  { %p743_p4 = por %p742_p3, %p741_p2 }
  0x61   :  { %p744_p5 = pnand %p743_p4, %p737_p1 }
  0x63   :  { %747 = shalt.err (!%p744_p5)
}
  0x64   :  { %88 = dma.hbm_to_vmem [thread:$0]  %s994_s7, 1024, %s899_s20, [#allocation12], %s782_s1, %s782_s1, %s783_s10  }
  0x65   :  { %770 = dma.done.wait [#allocation3], 64  }
  0x66   :  { %771 = vsyncadd [#allocation3], 4294967232 }
  0x67   :  { %772 = dma.done.wait [#allocation6], 256  }
  0x68   :  { %773 = vsyncadd [#allocation6], 4294967040 }
  0x69   :  { %774 = dma.done.wait [#allocation9], 2048  }
  0x6a   :  { %775 = vsyncadd [#allocation9], 4294965248 }
  0x6b   :  { %776 = dma.done.wait [#allocation12], 1024  }
  0x6c   :  { %777 = vsyncadd [#allocation12], 4294966272  ;;  %v788_v0 = vmov 0.0   ;;  %vm789_vm0 = vmmov 0   ;;  %v592_v1 = vld [vmem:[#allocation8] sm:$0xff]   ;;  %v593_v2 = vld [vmem:[#allocation8 + $0x8] sm:$0xff]  }
  0x6d   :  { %521 = vmatprep.subr.bf16.mxu0 %v788_v0  ;;  %537 = vmatprep.mubr.msk.bf16.mxu0 %vm789_vm0, %v788_v0  ;;  %v594_v3 = vld [vmem:[#allocation8 + $0x10] sm:$0xff]   ;;  %v600_v4 = vld [vmem:[#allocation10] sm:$0xff]   ;;  %v595_v5 = vld [vmem:[#allocation8 + $0x18] sm:$0xff]   ;;  %s790_s19 = smov [#allocation13]  }
  0x6e   :  { %541 = vmatprep.subr.bf16.mxu1 %v788_v0  ;;  %557 = vmatprep.mubr.msk.bf16.mxu1 %vm789_vm0, %v788_v0  ;;  %v601_v6 = vld [vmem:[#allocation10 + $0x8] sm:$0xff]   ;;  %v596_v7 = vld [vmem:[#allocation8 + $0x20] sm:$0xff]   ;;  %v602_v8 = vld [vmem:[#allocation10 + $0x10] sm:$0xff]   ;;  %s455_s20 = sshll.u32 %s790_s19, 4  ;;  %s456_s20 = int_to_ptr.vmem [resolvable:$true] %s455_s20 }
  0x6f   :  { %522 = vmatpush3.bf16.msra.mxu0 %v592_v1  ;;  %542 = vmatpush3.bf16.msra.mxu1 %v600_v4  ;;  %v597_v9 = vld [vmem:[#allocation8 + $0x28] sm:$0xff]   ;;  %v603_v10 = vld [vmem:[#allocation10 + $0x18] sm:$0xff]   ;;  %v598_v11 = vld [vmem:[#allocation8 + $0x30] sm:$0xff]   ;;  %p753_p7 = scmp.lt.s32.totalorder %s456_s20, %s456_s20 }
  0x70   :  { %523 = vmatprep.subr.bf16.mxu0 %v788_v0  ;;  %543 = vmatprep.subr.bf16.mxu1 %v788_v0  ;;  %v604_v12 = vld [vmem:[#allocation10 + $0x20] sm:$0xff]   ;;  %v599_v13 = vld [vmem:[#allocation8 + $0x38] sm:$0xff]   ;;  %v605_v14 = vld [vmem:[#allocation10 + $0x28] sm:$0xff]  }
  0x71   :  { %v110_v15 = vld [vmem:[#allocation2] sm:$0xf]  ;;  %v606_v16 = vld [vmem:[#allocation10 + $0x30] sm:$0xff]   ;;  %v607_v17 = vld [vmem:[#allocation10 + $0x38] sm:$0xff]  }
  0x72   :  { %v608_v18 = vld [vmem:[#allocation11] sm:$0xff]   ;;  %v609_v19 = vld [vmem:[#allocation11 + $0x8] sm:$0xff]   ;;  %v610_v20 = vld [vmem:[#allocation11 + $0x10] sm:$0xff]  }
  0x73   :  { %524 = vmatpush3.bf16.msra.mxu0 %v593_v2  ;;  %544 = vmatpush3.bf16.msra.mxu1 %v601_v6  ;;  %v611_v21 = vld [vmem:[#allocation11 + $0x18] sm:$0xff]   ;;  %v612_v22 = vld [vmem:[#allocation11 + $0x20] sm:$0xff]   ;;  %v613_v23 = vld [vmem:[#allocation11 + $0x28] sm:$0xff]  }
  0x74   :  { %525 = vmatprep.subr.bf16.mxu0 %v788_v0  ;;  %545 = vmatprep.subr.bf16.mxu1 %v788_v0  ;;  %v467_v24 = vld [vmem:[%s991_s4] ss:$0 sm:$0xff]  ;;  %v614_v32 = vld [vmem:[#allocation11 + $0x30] sm:$0xff]   ;;  %v615_v33 = vld [vmem:[#allocation11 + $0x38] sm:$0xff]  }
  0x75   :  { %v476_v34 = vld [vmem:[%s993_s6] ss:$0 sm:$0xff]  ;;  %s748_s6 = scalar_lea.vmem %s456_s20, 128 }
  0x76   :  { %v485_v42 = vld [vmem:[%s995_s8] ss:$0 sm:$0xff]  ;;  %p749_p6 = scmp.ne.s32.totalorder %s456_s20, %s748_s6  ;;  %p754_p8 = scmp.lt.s32.totalorder %s748_s6, %s748_s6 }
  0x77   :  { %526 = vmatpush3.bf16.msra.mxu0 %v594_v3  ;;  %546 = vmatpush3.bf16.msra.mxu1 %v602_v8 }
  0x78   :  { %527 = vmatprep.subr.bf16.mxu0 %v788_v0  ;;  %547 = vmatprep.subr.bf16.mxu1 %v788_v0  ;;  %p755_p9 = por %p754_p8, %p753_p7 }
  0x7a   :  { %p756_p10 = pnand %p755_p9, %p749_p6 }
  0x7b   :  { %528 = vmatpush3.bf16.msra.mxu0 %v595_v5  ;;  %548 = vmatpush3.bf16.msra.mxu1 %v603_v10 }
  0x7c   :  { %529 = vmatprep.subr.bf16.mxu0 %v788_v0  ;;  %549 = vmatprep.subr.bf16.mxu1 %v788_v0 }
  0x7f   :  { %530 = vmatpush3.bf16.msra.mxu0 %v596_v7  ;;  %550 = vmatpush3.bf16.msra.mxu1 %v604_v12 }
  0x80   :  { %531 = vmatprep.subr.bf16.mxu0 %v788_v0  ;;  %551 = vmatprep.subr.bf16.mxu1 %v788_v0 }
  0x83   :  { %532 = vmatpush3.bf16.msra.mxu0 %v597_v9  ;;  %552 = vmatpush3.bf16.msra.mxu1 %v605_v14 }
  0x84   :  { %533 = vmatprep.subr.bf16.mxu0 %v788_v0  ;;  %553 = vmatprep.subr.bf16.mxu1 %v788_v0 }
  0x87   :  { %534 = vmatpush3.bf16.msra.mxu0 %v598_v11  ;;  %554 = vmatpush3.bf16.msra.mxu1 %v606_v16 }
  0x88   :  { %535 = vmatprep.subr.bf16.mxu0 %v788_v0  ;;  %555 = vmatprep.subr.bf16.mxu1 %v788_v0 }
  0x8b   :  { %536 = vmatpush3.bf16.msra.mxu0 %v599_v13  ;;  %556 = vmatpush3.bf16.msra.mxu1 %v607_v17 }
  0x8c   :  { %561 = vmatprep.subr.bf16.mxu0 %v788_v0 }
  0x8e   :  { %538 = vmatmul.mubr.bf16.vlgmr.msra.gmra.mrb[0].mxu0 %v110_v15 }
  0x8f   :  { %577 = vmatprep.mubr.msk.bf16.mxu0 %vm789_vm0, %v788_v0  ;;  %562 = vmatpush3.bf16.msra.mxu0 %v608_v18 }
  0x90   :  { %563 = vmatprep.subr.bf16.mxu0 %v788_v0 }
  0x93   :  { %564 = vmatpush3.bf16.msra.mxu0 %v609_v19 }
  0x94   :  { %565 = vmatprep.subr.bf16.mxu0 %v788_v0 }
  0x97   :  { %566 = vmatpush3.bf16.msra.mxu0 %v610_v20 }
  0x98   :  { %567 = vmatprep.subr.bf16.mxu0 %v788_v0 }
  0x9b   :  { %568 = vmatpush3.bf16.msra.mxu0 %v611_v21 }
  0x9c   :  { %569 = vmatprep.subr.bf16.mxu0 %v788_v0 }
  0x9f   :  { %570 = vmatpush3.bf16.msra.mxu0 %v612_v22 }
  0xa0   :  { %571 = vmatprep.subr.bf16.mxu0 %v788_v0 }
  0xa3   :  { %572 = vmatpush3.bf16.msra.mxu0 %v613_v23 }
  0xa4   :  { %573 = vmatprep.subr.bf16.mxu0 %v788_v0 }
  0xa7   :  { %574 = vmatpush3.bf16.msra.mxu0 %v614_v32 }
  0xa8   :  { %575 = vmatprep.subr.bf16.mxu0 %v788_v0 }
  0xab   :  { %576 = vmatpush3.bf16.msra.mxu0 %v615_v33 }
 0x161   :  { %v216_v25 = vpop.f32.mrb[0].mxu0 }
 0x162   :  { %v217_v26 = vadd.f32 %v467_v24, %v216_v25  ;;  %v539_v27 = vpop.f32.mrb[1].mxu0 }
 0x163   :  { %v219_v28 = vpop.f32.mrb[2].mxu0 }
 0x164   :  { %v222_v29 = vmax.f32 %v217_v26, 0.0  ;;  %v540_v30 = vpop.f32.mrb[3].mxu0 }
 0x166   :  { %v223_v31 = vpack.c.bf16 %v222_v29, %v222_v29 }
 0x168   :  { %558 = vmatmul.mubr.bf16.vlgmr.msra.gmra.mrb[0].mxu1 %v223_v31 }
 0x23b   :  { %v329_v35 = vpop.f32.mrb[0].mxu1 }
 0x23c   :  { %v330_v36 = vadd.f32 %v476_v34, %v329_v35  ;;  %v559_v37 = vpop.f32.mrb[1].mxu1 }
 0x23d   :  { %v332_v38 = vpop.f32.mrb[2].mxu1 }
 0x23e   :  { %v335_v39 = vmax.f32 %v330_v36, 0.0  ;;  %v560_v40 = vpop.f32.mrb[3].mxu1 }
 0x240   :  { %v336_v41 = vpack.c.bf16 %v335_v39, %v335_v39 }
 0x242   :  { %578 = vmatmul.mubr.bf16.vlgmr.msra.gmra.mrb[4].mxu0 %v336_v41 }
 0x315   :  { %v442_v43 = vpop.f32.mrb[4].mxu0 }
 0x316   :  { %v443_v44 = vadd.f32 %v485_v42, %v442_v43  ;;  %v579_v45 = vpop.f32.mrb[5].mxu0 }
 0x317   :  { %v445_v46 = vpop.f32.mrb[6].mxu0 }
 0x318   :  { %448 = vst [vmem:[#allocation13] sm:$0xff] %v443_v44  ;;  %v580_v47 = vpop.f32.mrb[7].mxu0 }
 0x319   :  { %759 = shalt.err (!%p756_p10)
}
 0x31a   :  { %s760_s8 = scalar_lea.hbm %s996_s9, 128 }
 0x31b   :  { %p761_p11 = scmp.ne.s32.totalorder %s996_s9, %s760_s8  ;;  %p764_p12 = scmp.lt.u32.totalorder %s760_s8, %s996_s9 }
 0x31d   :  { %p766_p13 = pnand %p764_p12, %p761_p11 }
 0x31f   :  { %769 = shalt.err (!%p766_p13)
}
 0x320   :  { %458 = dma.vmem_to_hbm [thread:$0]  %s456_s20, 128, %s996_s9, [#allocation4]  }
 0x321   :  { %778 = dma.done.wait [#allocation4], 128  }
 0x322   :  { %779 = vsyncadd [#allocation4], 4294967168 }
 0x323   :  { %462 = vsyncpa [#allocation3], 1 }
 0x324   :  { %463 = vsyncpa [#allocation6], 1 }
 0x325   :  { %464 = vsyncpa [#allocation9], 1 }
 0x326   :  { %465 = vsyncpa [#allocation12], 1 }
 0x327   :  { %466 = vsyncpa [#allocation4], 1 }

</bundles_post_ra>
